<compile_context>
chip_gen: v7x
topology: tpu7x:2x2x1
jax: 0.10.0
libtpu: 0.0.40
codegen_flags: <defaults>
</compile_context>

<pallas_src>
import jax
import jax.numpy as jnp
from jax.experimental import pallas as pl
from jax.experimental.pallas import tpu as pltpu


_PARAM_NAMES = (
    # GINConv 1 MLP (block-diag packed over bond|angle lanes)
    "w1_1", "b1_1", "w1_2", "b1_2", "bn1_g", "bn1_b",
    # GINConv 2 MLP
    "w2_1", "b2_1", "w2_2", "b2_2", "bn2_g", "bn2_b",
    # fc1∘fc2 composed (block-diag), final fc
    "fc_w", "fc_b", "fcf_w", "fcf_b",
)


# --------------------------------------------------------------------------
# Fused Pallas kernel
# --------------------------------------------------------------------------
def fused_gin_kernel(nreal_ref, raw_ref, filt_ref, invg2_ref, repmat_ref,
                     adj_ref, pool_ref, *refs, gin_eps=0.0, bn_eps=1e-5):
    p = dict(zip(_PARAM_NAMES, refs[:len(_PARAM_NAMES)]))
    out_ref, embed_ref = refs[len(_PARAM_NAMES):]

    np_rows = adj_ref.shape[0]
    n_real = nreal_ref[0, 0]                         # SMEM scalar (no recompile)
    nf = n_real.astype(jnp.float32)

    # (1, NP) mask row over real (non-padding) nodes; BN batch statistics are
    # computed through the MXU with it.
    col_id = jax.lax.broadcasted_iota(jnp.int32, (1, np_rows), 1)
    mask_row = (col_id < n_real).astype(jnp.float32)

    def mm(a, b):
        # bf16 MXU matmul, f32 accumulation
        return jnp.dot(a.astype(jnp.bfloat16), b.astype(jnp.bfloat16),
                       preferred_element_type=jnp.float32)

    adj = adj_ref[...]                               # (NP, NP) bf16

    # ---- Gaussian basis expansion (in-kernel) ------------------------------
    # Replicate each raw distance `steps` times with a 0/1 matrix on the MXU
    # (kept f32: tiny K, precision of (d - filter) matters), exp on the EUP.
    rep = jnp.dot(raw_ref[...], repmat_ref[...],
                  preferred_element_type=jnp.float32)        # (NP, GW)
    d = rep - filt_ref[...]
    x = jnp.exp(-(d * d) * invg2_ref[...])                   # (NP, GW) f32

    # ---- BatchNorm1d (train-mode batch stats, biased var, as torch) -------
    def bnorm(h, g_ref, b_ref):
        s1 = mm(mask_row, h)                                  # (1, 128) sums
        s2 = mm(mask_row, h * h)                              # (1, 128) sq sums
        mean = s1 / nf
        var = jnp.maximum(s2 / nf - mean * mean, 0.0)
        scale = g_ref[...] * jax.lax.rsqrt(var + bn_eps)
        shift = b_ref[...] - mean * scale
        return h * scale + shift                              # one mul + one add

    # ---- GINConv layer: h = relu(MLP((1+eps)*x + sum_{j->i} x_j)) ; BN ----
    def gin_layer(xin, w1, b1, w2, b2, bng, bnb):
        agg = mm(adj, xin)                       # shared aggregation, both branches
        z = (1.0 + gin_eps) * xin + agg
        h = jnp.maximum(mm(z, w1[...]) + b1[...], 0.0)        # Linear -> ReLU
        h = mm(h, w2[...]) + b2[...]                          # -> Linear
        h = jnp.maximum(h, 0.0)                               # F.relu(conv(...))
        return bnorm(h, bng, bnb)

    h = gin_layer(x, p["w1_1"], p["b1_1"], p["w1_2"], p["b1_2"],
                  p["bn1_g"], p["bn1_b"])
    h = gin_layer(h, p["w2_1"], p["b2_1"], p["w2_2"], p["b2_2"],
                  p["bn2_g"], p["bn2_b"])

    # fc1∘fc2 composed, block-diagonal: output lanes [0:16] are already the
    # [bond(8) | angle(8)] concat == crys_fea of the reference.
    f = mm(h, p["fc_w"][...]) + p["fc_b"][...]
    # (dropout applied as identity — see TODO at top)

    pooled = mm(pool_ref[...], f)                             # (RP, 128)
    embed_ref[...] = pooled                                    # crys_fea in [:, :16]
    out_ref[...] = mm(pooled, p["fcf_w"][...]) + p["fcf_b"][...]


# --------------------------------------------------------------------------
# pallas_call plumbing
# --------------------------------------------------------------------------
def _full_spec(shape):
    nd = len(shape)
    return pl.BlockSpec(shape, lambda i, _nd=nd: (0,) * _nd)


def run_fused(kernel, inputs, out_shapes):
    in_specs = [pl.BlockSpec(memory_space=pltpu.MemorySpace.SMEM)]  # n_real scalar
    in_specs += [_full_spec(a.shape) for a in inputs[1:]]
    return pl.pallas_call(
        kernel,
        out_shape=out_shapes,
        grid=(1,),
        in_specs=in_specs,
        out_specs=tuple(_full_spec(s.shape) for s in out_shapes),
        compiler_params=pltpu.CompilerParams(
            dimension_semantics=("arbitrary",),
            vmem_limit_bytes=32 * 1024 * 1024),
    )(*inputs)


# --------------------------------------------------------------------------
# Model wrapper (packed parameter construction + plain-JAX glue)
# --------------------------------------------------------------------------
def _ceil_to(n, m):
    return max(m, -(-n // m) * m)


class GINPallas:
    H = 32     # real hidden width per branch (nn.Linear(..., 32))
    HP = 128   # lane-packed width: bond in lanes [0:32], angle in [32:64]

    def __init__(self, gbf_bond, gbf_angle, n_classification, neigh,
                 pooling, embedding, key):
        self.pooling = pooling
        self.embedding = embedding
        self.n_class = n_classification
        self.neigh = neigh
        self.CLP = _ceil_to(n_classification, 128)

        self.steps_b = gbf_bond['steps']
        self.steps_a = gbf_angle['steps']
        self.IB = self.steps_b * neigh                 # bond gbf width
        self.IA = self.steps_a * neigh * neigh         # angle gbf width
        self.GW = _ceil_to(self.IB + self.IA, 128)     # packed gbf width
        self.RAW = neigh + neigh * neigh               # raw distance width
        self.RAWP = _ceil_to(self.RAW, 8)

        f32 = jnp.float32

        # packed, lane-tiled filter bank + per-lane 1/gamma^2; padded lanes get
        # a huge filter so exp(...) underflows to exactly 0 there.
        filt_b = jnp.linspace(gbf_bond['dmin'], gbf_bond['dmax'], self.steps_b)
        filt_a = jnp.linspace(gbf_angle['dmin'], gbf_angle['dmax'], self.steps_a)
        gamma_b = (gbf_bond['dmax'] - gbf_bond['dmin']) / self.steps_b
        gamma_a = (gbf_angle['dmax'] - gbf_angle['dmin']) / self.steps_a
        pad = self.GW - self.IB - self.IA
        filt = jnp.concatenate([jnp.tile(filt_b, neigh),
                                jnp.tile(filt_a, neigh * neigh),
                                jnp.full((pad,), 1e4)])
        self.filt = filt.reshape(1, self.GW).astype(f32)
        invg2 = jnp.concatenate([jnp.full((self.IB,), 1.0 / gamma_b ** 2),
                                 jnp.full((self.IA,), 1.0 / gamma_a ** 2),
                                 jnp.ones((pad,))])
        self.invg2 = invg2.reshape(1, self.GW).astype(f32)

        # 0/1 replication matrix: rep[:, j*steps+k] = raw[:, j]
        R = jnp.zeros((self.RAWP, self.GW), f32)
        R = R.at[jnp.repeat(jnp.arange(self.neigh), self.steps_b),
                 jnp.arange(self.IB)].set(1.0)
        R = R.at[self.neigh + jnp.repeat(jnp.arange(self.neigh * self.neigh),
                                         self.steps_a),
                 self.IB + jnp.arange(self.IA)].set(1.0)
        self.repmat = R

        H, HP, CLP = self.H, self.HP, self.CLP
        keys = iter(jax.random.split(key, 16))

        def lin(fan_in, fan_out):
            kw, kb = jax.random.split(next(keys))
            w = (jax.random.normal(kw, (fan_in, fan_out), f32)
                 / jnp.sqrt(jnp.float32(fan_in)))
            b = jax.random.normal(kb, (1, fan_out), f32) * 0.01
            return w, b

        def pad2(w, rows, cols):
            return jnp.zeros((rows, cols), f32).at[:w.shape[0], :w.shape[1]].set(w)

        def bdiag(wb, wa, rows, cols, roff, coff):
            m = pad2(wb, rows, cols)
            return m.at[roff:roff + wa.shape[0], coff:coff + wa.shape[1]].set(wa)

        p = {}
        # ---- GINConv 1 MLPs: Linear(in,32)->ReLU->Linear(32,32), packed ----
        w1b, b1b = lin(self.IB, H); w1a, b1a = lin(self.IA, H)
        w2b, b2b = lin(H, H);       w2a, b2a = lin(H, H)
        p["w1_1"] = bdiag(w1b, w1a, self.GW, HP, self.IB, H).astype(jnp.bfloat16)
        p["b1_1"] = bdiag(b1b, b1a, 1, HP, 0, H)
        p["w1_2"] = bdiag(w2b, w2a, HP, HP, H, H).astype(jnp.bfloat16)
        p["b1_2"] = bdiag(b2b, b2a, 1, HP, 0, H)
        # ---- GINConv 2 MLPs -------------------------------------------------
        w1b, b1b = lin(H, H); w1a, b1a = lin(H, H)
        w2b, b2b = lin(H, H); w2a, b2a = lin(H, H)
        p["w2_1"] = bdiag(w1b, w1a, HP, HP, H, H).astype(jnp.bfloat16)
        p["b2_1"] = bdiag(b1b, b1a, 1, HP, 0, H)
        p["w2_2"] = bdiag(w2b, w2a, HP, HP, H, H).astype(jnp.bfloat16)
        p["b2_2"] = bdiag(b2b, b2a, 1, HP, 0, H)
        # ---- BatchNorm1d(32) at torch init (weight=1, bias=0); pads inert ---
        for name in ("bn1", "bn2"):
            p[name + "_g"] = jnp.ones((1, HP), f32)
            p[name + "_b"] = jnp.zeros((1, HP), f32)
        # ---- fc1(32->16) ∘ fc2(16->8) composed offline per branch ----------
        f1bw, f1bb = lin(H, 16); f2bw, f2bb = lin(16, 8)
        f1aw, f1ab = lin(H, 16); f2aw, f2ab = lin(16, 8)
        wcb, bcb = f1bw @ f2bw, f1bb @ f2bw + f2bb
        wca, bca = f1aw @ f2aw, f1ab @ f2aw + f2ab
        p["fc_w"] = bdiag(wcb, wca, HP, HP, H, 8).astype(jnp.bfloat16)
        p["fc_b"] = bdiag(bcb, bca, 1, HP, 0, 8)
        # ---- final fc: Linear(16 -> n_class) on the concat lanes [0:16] ----
        fw, fb = lin(16, n_classification)
        p["fcf_w"] = pad2(fw, HP, CLP).astype(jnp.bfloat16)
        p["fcf_b"] = pad2(fb, 1, CLP)
        self.params = p

    def forward(self, data):
        bond_fea, angle_fea, species, nbr_idx, crys_idx = data
        del species                                   # unused by the reference
        n = bond_fea.shape[0]
        neigh = nbr_idx.shape[1]
        NP = _ceil_to(n, 16)                          # sublane-friendly for bf16
        f32 = jnp.float32

        # raw packed distances [bond (neigh) | angle (neigh^2)]; the gbf
        # expansion happens inside the kernel (32x/16x less HBM traffic).
        raw = jnp.concatenate([bond_fea.astype(f32).reshape(n, -1),
                               angle_fea.astype(f32).reshape(n, -1)], axis=1)
        raw_p = jnp.zeros((NP, self.RAWP), f32).at[:n, :self.RAW].set(raw)

        # GIN sum-aggregation adjacency: edge (src=i, dst=nbr_idx[i,j]) ->
        # A[dst, src] += 1 ; bf16 for the MXU.
        src = jnp.repeat(jnp.arange(n, dtype=jnp.int32), neigh)
        dst = nbr_idx.reshape(-1).astype(jnp.int32)
        adj = jnp.zeros((NP, NP), f32).at[dst, src].add(1.0).astype(jnp.bfloat16)

        # pooling matrix (mean per crystal) or masked identity when pooling=False
        if self.pooling:
            n_out = len(crys_idx)
            RP = _ceil_to(n_out, 16)
            node_range = jnp.arange(NP)
            rows = [jnp.where((node_range >= s) & (node_range < e),
                              1.0 / float(e - s), 0.0) for (s, e) in crys_idx]
            pool_mat = jnp.zeros((RP, NP), f32).at[:n_out].set(
                jnp.stack(rows).astype(f32))
        else:
            n_out = n
            RP = NP
            pool_mat = (jnp.eye(NP, dtype=f32)
                        * (jnp.arange(NP)[:, None] < n).astype(f32))
        pool_mat = pool_mat.astype(jnp.bfloat16)

        nreal = jnp.array([[n]], dtype=jnp.int32)     # SMEM scalar

        inputs = [nreal, raw_p, self.filt, self.invg2, self.repmat, adj, pool_mat]
        inputs += [self.params[name] for name in _PARAM_NAMES]

        out_shapes = (
            jax.ShapeDtypeStruct((RP, self.CLP), f32),   # padded logits
            jax.ShapeDtypeStruct((RP, self.HP), f32),    # padded crys_fea / embed
        )
        out_pad, crys_pad = run_fused(fused_gin_kernel, inputs, out_shapes)

        out = out_pad[:n_out, :self.n_class]
        if self.embedding:
            return out, crys_pad[:n_out, :16]            # [bond8 | angle8]
        return out


# --------------------------------------------------------------------------
if __name__ == "__main__":
    key = jax.random.PRNGKey(0)
    k_bond, k_angle, k_nbr, k_params = jax.random.split(key, 4)

    # small, module-consistent shapes
    N_ATOMS = 12
    NEIGH = 4
    gbf_bond = dict(dmin=0.0, dmax=8.0, steps=32)    # bond in-dim  = 32*4   = 128
    gbf_angle = dict(dmin=-1.0, dmax=1.0, steps=16)  # angle in-dim = 16*4*4 = 256
    N_CLASS = 3

    bond_fea = jax.random.uniform(k_bond, (N_ATOMS, NEIGH), jnp.float32, 0.0, 8.0)
    angle_fea = jax.random.uniform(k_angle, (N_ATOMS, NEIGH, NEIGH), jnp.float32,
                                   -1.0, 1.0)
    species = jnp.zeros((N_ATOMS,), jnp.int32)       # unused by forward
    nbr_idx = jax.random.randint(k_nbr, (N_ATOMS, NEIGH), 0, N_ATOMS)
    crys_idx = [(0, 6), (6, 12)]                     # two crystals

    model = GINPallas(gbf_bond, gbf_angle, N_CLASS, NEIGH,
                      pooling=True, embedding=True, key=k_params)

    out, embed = model.forward((bond_fea, angle_fea, species, nbr_idx, crys_idx))
    jax.block_until_ready(out)
    jax.block_until_ready(embed)

    assert out.shape == (len(crys_idx), N_CLASS), out.shape
    assert embed.shape == (len(crys_idx), 16), embed.shape
    assert bool(jnp.all(jnp.isfinite(out))) and bool(jnp.all(jnp.isfinite(embed)))
    print("KERNEL_OK")
</pallas_src>

<mosaic_0001>
module attributes {stable_mosaic.version = 11 : i64} {
  func.func @fused_gin_kernel(%arg0: i32, %arg1: memref<1x1xi32, #tpu.memory_space<smem>>, %arg2: memref<16x24xf32, #tpu.memory_space<vmem>>, %arg3: memref<1x384xf32, #tpu.memory_space<vmem>>, %arg4: memref<1x384xf32, #tpu.memory_space<vmem>>, %arg5: memref<24x384xf32, #tpu.memory_space<vmem>>, %arg6: memref<16x16xbf16, #tpu.memory_space<vmem>>, %arg7: memref<16x16xbf16, #tpu.memory_space<vmem>>, %arg8: memref<384x128xbf16, #tpu.memory_space<vmem>>, %arg9: memref<1x128xf32, #tpu.memory_space<vmem>>, %arg10: memref<128x128xbf16, #tpu.memory_space<vmem>>, %arg11: memref<1x128xf32, #tpu.memory_space<vmem>>, %arg12: memref<1x128xf32, #tpu.memory_space<vmem>>, %arg13: memref<1x128xf32, #tpu.memory_space<vmem>>, %arg14: memref<128x128xbf16, #tpu.memory_space<vmem>>, %arg15: memref<1x128xf32, #tpu.memory_space<vmem>>, %arg16: memref<128x128xbf16, #tpu.memory_space<vmem>>, %arg17: memref<1x128xf32, #tpu.memory_space<vmem>>, %arg18: memref<1x128xf32, #tpu.memory_space<vmem>>, %arg19: memref<1x128xf32, #tpu.memory_space<vmem>>, %arg20: memref<128x128xbf16, #tpu.memory_space<vmem>>, %arg21: memref<1x128xf32, #tpu.memory_space<vmem>>, %arg22: memref<128x128xbf16, #tpu.memory_space<vmem>>, %arg23: memref<1x128xf32, #tpu.memory_space<vmem>>, %arg24: memref<16x128xf32, #tpu.memory_space<vmem>>, %arg25: memref<16x128xf32, #tpu.memory_space<vmem>>) attributes {dimension_semantics = [#tpu.dimension_semantics<arbitrary>], iteration_bounds = array<i64: 1>, scalar_prefetch = 0 : i64, scratch_operands = 0 : i64, tpu.core_type = #tpu.core_type<tc>, window_params = [{transform_indices = @transform_0, window_bounds = array<i64: 1, 1>}, {pipeline_mode = #tpu.pipeline_mode<synchronous>, transform_indices = @transform_1, window_bounds = array<i64: 16, 24>}, {pipeline_mode = #tpu.pipeline_mode<synchronous>, transform_indices = @transform_2, window_bounds = array<i64: 1, 384>}, {pipeline_mode = #tpu.pipeline_mode<synchronous>, transform_indices = @transform_3, window_bounds = array<i64: 1, 384>}, {pipeline_mode = #tpu.pipeline_mode<synchronous>, transform_indices = @transform_4, window_bounds = array<i64: 24, 384>}, {pipeline_mode = #tpu.pipeline_mode<synchronous>, transform_indices = @transform_5, window_bounds = array<i64: 16, 16>}, {pipeline_mode = #tpu.pipeline_mode<synchronous>, transform_indices = @transform_6, window_bounds = array<i64: 16, 16>}, {pipeline_mode = #tpu.pipeline_mode<synchronous>, transform_indices = @transform_7, window_bounds = array<i64: 384, 128>}, {pipeline_mode = #tpu.pipeline_mode<synchronous>, transform_indices = @transform_8, window_bounds = array<i64: 1, 128>}, {pipeline_mode = #tpu.pipeline_mode<synchronous>, transform_indices = @transform_9, window_bounds = array<i64: 128, 128>}, {pipeline_mode = #tpu.pipeline_mode<synchronous>, transform_indices = @transform_10, window_bounds = array<i64: 1, 128>}, {pipeline_mode = #tpu.pipeline_mode<synchronous>, transform_indices = @transform_11, window_bounds = array<i64: 1, 128>}, {pipeline_mode = #tpu.pipeline_mode<synchronous>, transform_indices = @transform_12, window_bounds = array<i64: 1, 128>}, {pipeline_mode = #tpu.pipeline_mode<synchronous>, transform_indices = @transform_13, window_bounds = array<i64: 128, 128>}, {pipeline_mode = #tpu.pipeline_mode<synchronous>, transform_indices = @transform_14, window_bounds = array<i64: 1, 128>}, {pipeline_mode = #tpu.pipeline_mode<synchronous>, transform_indices = @transform_15, window_bounds = array<i64: 128, 128>}, {pipeline_mode = #tpu.pipeline_mode<synchronous>, transform_indices = @transform_16, window_bounds = array<i64: 1, 128>}, {pipeline_mode = #tpu.pipeline_mode<synchronous>, transform_indices = @transform_17, window_bounds = array<i64: 1, 128>}, {pipeline_mode = #tpu.pipeline_mode<synchronous>, transform_indices = @transform_18, window_bounds = array<i64: 1, 128>}, {pipeline_mode = #tpu.pipeline_mode<synchronous>, transform_indices = @transform_19, window_bounds = array<i64: 128, 128>}, {pipeline_mode = #tpu.pipeline_mode<synchronous>, transform_indices = @transform_20, window_bounds = array<i64: 1, 128>}, {pipeline_mode = #tpu.pipeline_mode<synchronous>, transform_indices = @transform_21, window_bounds = array<i64: 128, 128>}, {pipeline_mode = #tpu.pipeline_mode<synchronous>, transform_indices = @transform_22, window_bounds = array<i64: 1, 128>}, {pipeline_mode = #tpu.pipeline_mode<synchronous>, transform_indices = @transform_23, window_bounds = array<i64: 16, 128>}, {pipeline_mode = #tpu.pipeline_mode<synchronous>, transform_indices = @transform_24, window_bounds = array<i64: 16, 128>}]} {
    %c0 = arith.constant 0 : index
    %c0_0 = arith.constant 0 : index
    %0 = memref.load %arg1[%c0, %c0_0] : memref<1x1xi32, #tpu.memory_space<smem>>
    %1 = arith.sitofp %0 : i32 to f32
    %2 = tpu.iota {dimensions = array<i32: 1>} : vector<1x16xi32>
    %3 = vector.broadcast %0 : i32 to vector<1x16xi32>
    %4 = arith.cmpi slt, %2, %3 : vector<1x16xi32>
    %5 = arith.extui %4 : vector<1x16xi1> to vector<1x16xi32>
    %6 = arith.sitofp %5 : vector<1x16xi32> to vector<1x16xf32>
    %c0_1 = arith.constant 0 : index
    %c0_2 = arith.constant 0 : index
    %7 = vector.load %arg6[%c0_1, %c0_2] : memref<16x16xbf16, #tpu.memory_space<vmem>>, vector<16x16xbf16>
    %c0_3 = arith.constant 0 : index
    %c0_4 = arith.constant 0 : index
    %8 = vector.load %arg2[%c0_3, %c0_4] : memref<16x24xf32, #tpu.memory_space<vmem>>, vector<16x24xf32>
    %c0_5 = arith.constant 0 : index
    %c0_6 = arith.constant 0 : index
    %9 = vector.load %arg5[%c0_5, %c0_6] : memref<24x384xf32, #tpu.memory_space<vmem>>, vector<24x384xf32>
    %cst = arith.constant dense<0.000000e+00> : vector<16x384xf32>
    %10 = tpu.matmul %8, %9, %cst {dimension_numbers = #tpu.dot_dimension_numbers<[1], [0], [0], [1], [0, 0, 1, 1], [], []>} : vector<16x24xf32>, vector<24x384xf32>, vector<16x384xf32> -> vector<16x384xf32>
    %c0_7 = arith.constant 0 : index
    %c0_8 = arith.constant 0 : index
    %11 = vector.load %arg3[%c0_7, %c0_8] : memref<1x384xf32, #tpu.memory_space<vmem>>, vector<1x384xf32>
    %12 = vector.broadcast %11 : vector<1x384xf32> to vector<16x384xf32>
    %13 = arith.subf %10, %12 : vector<16x384xf32>
    %14 = arith.mulf %13, %13 : vector<16x384xf32>
    %cst_9 = arith.constant 0.000000e+00 : f32
    %15 = vector.broadcast %cst_9 : f32 to vector<16x384xf32>
    %16 = arith.subf %15, %14 : vector<16x384xf32>
    %c0_10 = arith.constant 0 : index
    %c0_11 = arith.constant 0 : index
    %17 = vector.load %arg4[%c0_10, %c0_11] : memref<1x384xf32, #tpu.memory_space<vmem>>, vector<1x384xf32>
    %18 = vector.broadcast %17 : vector<1x384xf32> to vector<16x384xf32>
    %19 = arith.mulf %16, %18 : vector<16x384xf32>
    %20 = math.exp %19 : vector<16x384xf32>
    %21 = arith.truncf %20 : vector<16x384xf32> to vector<16x384xbf16>
    %cst_12 = arith.constant dense<0.000000e+00> : vector<16x384xf32>
    %22 = tpu.matmul %7, %21, %cst_12 {dimension_numbers = #tpu.dot_dimension_numbers<[1], [0], [0], [1], [0, 0, 1, 1], [], []>} : vector<16x16xbf16>, vector<16x384xbf16>, vector<16x384xf32> -> vector<16x384xf32>
    %cst_13 = arith.constant 1.000000e+00 : f32
    %23 = vector.broadcast %cst_13 : f32 to vector<16x384xf32>
    %24 = arith.mulf %23, %20 : vector<16x384xf32>
    %25 = arith.addf %24, %22 : vector<16x384xf32>
    %c0_14 = arith.constant 0 : index
    %c0_15 = arith.constant 0 : index
    %26 = vector.load %arg8[%c0_14, %c0_15] : memref<384x128xbf16, #tpu.memory_space<vmem>>, vector<384x128xbf16>
    %27 = arith.truncf %25 : vector<16x384xf32> to vector<16x384xbf16>
    %cst_16 = arith.constant dense<0.000000e+00> : vector<16x128xf32>
    %28 = tpu.matmul %27, %26, %cst_16 {dimension_numbers = #tpu.dot_dimension_numbers<[1], [0], [0], [1], [0, 0, 1, 1], [], []>} : vector<16x384xbf16>, vector<384x128xbf16>, vector<16x128xf32> -> vector<16x128xf32>
    %c0_17 = arith.constant 0 : index
    %c0_18 = arith.constant 0 : index
    %29 = vector.load %arg9[%c0_17, %c0_18] : memref<1x128xf32, #tpu.memory_space<vmem>>, vector<1x128xf32>
    %30 = vector.broadcast %29 : vector<1x128xf32> to vector<16x128xf32>
    %31 = arith.addf %28, %30 : vector<16x128xf32>
    %cst_19 = arith.constant 0.000000e+00 : f32
    %32 = vector.broadcast %cst_19 : f32 to vector<16x128xf32>
    %33 = arith.maximumf %31, %32 : vector<16x128xf32>
    %c0_20 = arith.constant 0 : index
    %c0_21 = arith.constant 0 : index
    %34 = vector.load %arg10[%c0_20, %c0_21] : memref<128x128xbf16, #tpu.memory_space<vmem>>, vector<128x128xbf16>
    %35 = arith.truncf %33 : vector<16x128xf32> to vector<16x128xbf16>
    %cst_22 = arith.constant dense<0.000000e+00> : vector<16x128xf32>
    %36 = tpu.matmul %35, %34, %cst_22 {dimension_numbers = #tpu.dot_dimension_numbers<[1], [0], [0], [1], [0, 0, 1, 1], [], []>} : vector<16x128xbf16>, vector<128x128xbf16>, vector<16x128xf32> -> vector<16x128xf32>
    %c0_23 = arith.constant 0 : index
    %c0_24 = arith.constant 0 : index
    %37 = vector.load %arg11[%c0_23, %c0_24] : memref<1x128xf32, #tpu.memory_space<vmem>>, vector<1x128xf32>
    %38 = vector.broadcast %37 : vector<1x128xf32> to vector<16x128xf32>
    %39 = arith.addf %36, %38 : vector<16x128xf32>
    %cst_25 = arith.constant 0.000000e+00 : f32
    %40 = vector.broadcast %cst_25 : f32 to vector<16x128xf32>
    %41 = arith.maximumf %39, %40 : vector<16x128xf32>
    %42 = arith.truncf %6 : vector<1x16xf32> to vector<1x16xbf16>
    %43 = arith.truncf %41 : vector<16x128xf32> to vector<16x128xbf16>
    %cst_26 = arith.constant dense<0.000000e+00> : vector<1x128xf32>
    %44 = tpu.matmul %42, %43, %cst_26 {dimension_numbers = #tpu.dot_dimension_numbers<[1], [0], [0], [1], [0, 0, 1, 1], [], []>} : vector<1x16xbf16>, vector<16x128xbf16>, vector<1x128xf32> -> vector<1x128xf32>
    %45 = arith.mulf %41, %41 : vector<16x128xf32>
    %46 = arith.truncf %6 : vector<1x16xf32> to vector<1x16xbf16>
    %47 = arith.truncf %45 : vector<16x128xf32> to vector<16x128xbf16>
    %cst_27 = arith.constant dense<0.000000e+00> : vector<1x128xf32>
    %48 = tpu.matmul %46, %47, %cst_27 {dimension_numbers = #tpu.dot_dimension_numbers<[1], [0], [0], [1], [0, 0, 1, 1], [], []>} : vector<1x16xbf16>, vector<16x128xbf16>, vector<1x128xf32> -> vector<1x128xf32>
    %49 = vector.broadcast %1 : f32 to vector<1x128xf32>
    %50 = arith.divf %44, %49 : vector<1x128xf32>
    %51 = vector.broadcast %1 : f32 to vector<1x128xf32>
    %52 = arith.divf %48, %51 : vector<1x128xf32>
    %53 = arith.mulf %50, %50 : vector<1x128xf32>
    %54 = arith.subf %52, %53 : vector<1x128xf32>
    %cst_28 = arith.constant 0.000000e+00 : f32
    %55 = vector.broadcast %cst_28 : f32 to vector<1x128xf32>
    %56 = arith.maximumf %54, %55 : vector<1x128xf32>
    %c0_29 = arith.constant 0 : index
    %c0_30 = arith.constant 0 : index
    %57 = vector.load %arg12[%c0_29, %c0_30] : memref<1x128xf32, #tpu.memory_space<vmem>>, vector<1x128xf32>
    %cst_31 = arith.constant 9.99999974E-6 : f32
    %58 = vector.broadcast %cst_31 : f32 to vector<1x128xf32>
    %59 = arith.addf %56, %58 : vector<1x128xf32>
    %60 = math.rsqrt %59 : vector<1x128xf32>
    %61 = arith.mulf %57, %60 : vector<1x128xf32>
    %c0_32 = arith.constant 0 : index
    %c0_33 = arith.constant 0 : index
    %62 = vector.load %arg13[%c0_32, %c0_33] : memref<1x128xf32, #tpu.memory_space<vmem>>, vector<1x128xf32>
    %63 = arith.mulf %50, %61 : vector<1x128xf32>
    %64 = arith.subf %62, %63 : vector<1x128xf32>
    %65 = vector.broadcast %61 : vector<1x128xf32> to vector<16x128xf32>
    %66 = arith.mulf %41, %65 : vector<16x128xf32>
    %67 = vector.broadcast %64 : vector<1x128xf32> to vector<16x128xf32>
    %68 = arith.addf %66, %67 : vector<16x128xf32>
    %69 = arith.truncf %68 : vector<16x128xf32> to vector<16x128xbf16>
    %cst_34 = arith.constant dense<0.000000e+00> : vector<16x128xf32>
    %70 = tpu.matmul %7, %69, %cst_34 {dimension_numbers = #tpu.dot_dimension_numbers<[1], [0], [0], [1], [0, 0, 1, 1], [], []>} : vector<16x16xbf16>, vector<16x128xbf16>, vector<16x128xf32> -> vector<16x128xf32>
    %cst_35 = arith.constant 1.000000e+00 : f32
    %71 = vector.broadcast %cst_35 : f32 to vector<16x128xf32>
    %72 = arith.mulf %71, %68 : vector<16x128xf32>
    %73 = arith.addf %72, %70 : vector<16x128xf32>
    %c0_36 = arith.constant 0 : index
    %c0_37 = arith.constant 0 : index
    %74 = vector.load %arg14[%c0_36, %c0_37] : memref<128x128xbf16, #tpu.memory_space<vmem>>, vector<128x128xbf16>
    %75 = arith.truncf %73 : vector<16x128xf32> to vector<16x128xbf16>
    %cst_38 = arith.constant dense<0.000000e+00> : vector<16x128xf32>
    %76 = tpu.matmul %75, %74, %cst_38 {dimension_numbers = #tpu.dot_dimension_numbers<[1], [0], [0], [1], [0, 0, 1, 1], [], []>} : vector<16x128xbf16>, vector<128x128xbf16>, vector<16x128xf32> -> vector<16x128xf32>
    %c0_39 = arith.constant 0 : index
    %c0_40 = arith.constant 0 : index
    %77 = vector.load %arg15[%c0_39, %c0_40] : memref<1x128xf32, #tpu.memory_space<vmem>>, vector<1x128xf32>
    %78 = vector.broadcast %77 : vector<1x128xf32> to vector<16x128xf32>
    %79 = arith.addf %76, %78 : vector<16x128xf32>
    %cst_41 = arith.constant 0.000000e+00 : f32
    %80 = vector.broadcast %cst_41 : f32 to vector<16x128xf32>
    %81 = arith.maximumf %79, %80 : vector<16x128xf32>
    %c0_42 = arith.constant 0 : index
    %c0_43 = arith.constant 0 : index
    %82 = vector.load %arg16[%c0_42, %c0_43] : memref<128x128xbf16, #tpu.memory_space<vmem>>, vector<128x128xbf16>
    %83 = arith.truncf %81 : vector<16x128xf32> to vector<16x128xbf16>
    %cst_44 = arith.constant dense<0.000000e+00> : vector<16x128xf32>
    %84 = tpu.matmul %83, %82, %cst_44 {dimension_numbers = #tpu.dot_dimension_numbers<[1], [0], [0], [1], [0, 0, 1, 1], [], []>} : vector<16x128xbf16>, vector<128x128xbf16>, vector<16x128xf32> -> vector<16x128xf32>
    %c0_45 = arith.constant 0 : index
    %c0_46 = arith.constant 0 : index
    %85 = vector.load %arg17[%c0_45, %c0_46] : memref<1x128xf32, #tpu.memory_space<vmem>>, vector<1x128xf32>
    %86 = vector.broadcast %85 : vector<1x128xf32> to vector<16x128xf32>
    %87 = arith.addf %84, %86 : vector<16x128xf32>
    %cst_47 = arith.constant 0.000000e+00 : f32
    %88 = vector.broadcast %cst_47 : f32 to vector<16x128xf32>
    %89 = arith.maximumf %87, %88 : vector<16x128xf32>
    %90 = arith.truncf %6 : vector<1x16xf32> to vector<1x16xbf16>
    %91 = arith.truncf %89 : vector<16x128xf32> to vector<16x128xbf16>
    %cst_48 = arith.constant dense<0.000000e+00> : vector<1x128xf32>
    %92 = tpu.matmul %90, %91, %cst_48 {dimension_numbers = #tpu.dot_dimension_numbers<[1], [0], [0], [1], [0, 0, 1, 1], [], []>} : vector<1x16xbf16>, vector<16x128xbf16>, vector<1x128xf32> -> vector<1x128xf32>
    %93 = arith.mulf %89, %89 : vector<16x128xf32>
    %94 = arith.truncf %6 : vector<1x16xf32> to vector<1x16xbf16>
    %95 = arith.truncf %93 : vector<16x128xf32> to vector<16x128xbf16>
    %cst_49 = arith.constant dense<0.000000e+00> : vector<1x128xf32>
    %96 = tpu.matmul %94, %95, %cst_49 {dimension_numbers = #tpu.dot_dimension_numbers<[1], [0], [0], [1], [0, 0, 1, 1], [], []>} : vector<1x16xbf16>, vector<16x128xbf16>, vector<1x128xf32> -> vector<1x128xf32>
    %97 = vector.broadcast %1 : f32 to vector<1x128xf32>
    %98 = arith.divf %92, %97 : vector<1x128xf32>
    %99 = vector.broadcast %1 : f32 to vector<1x128xf32>
    %100 = arith.divf %96, %99 : vector<1x128xf32>
    %101 = arith.mulf %98, %98 : vector<1x128xf32>
    %102 = arith.subf %100, %101 : vector<1x128xf32>
    %cst_50 = arith.constant 0.000000e+00 : f32
    %103 = vector.broadcast %cst_50 : f32 to vector<1x128xf32>
    %104 = arith.maximumf %102, %103 : vector<1x128xf32>
    %c0_51 = arith.constant 0 : index
    %c0_52 = arith.constant 0 : index
    %105 = vector.load %arg18[%c0_51, %c0_52] : memref<1x128xf32, #tpu.memory_space<vmem>>, vector<1x128xf32>
    %cst_53 = arith.constant 9.99999974E-6 : f32
    %106 = vector.broadcast %cst_53 : f32 to vector<1x128xf32>
    %107 = arith.addf %104, %106 : vector<1x128xf32>
    %108 = math.rsqrt %107 : vector<1x128xf32>
    %109 = arith.mulf %105, %108 : vector<1x128xf32>
    %c0_54 = arith.constant 0 : index
    %c0_55 = arith.constant 0 : index
    %110 = vector.load %arg19[%c0_54, %c0_55] : memref<1x128xf32, #tpu.memory_space<vmem>>, vector<1x128xf32>
    %111 = arith.mulf %98, %109 : vector<1x128xf32>
    %112 = arith.subf %110, %111 : vector<1x128xf32>
    %113 = vector.broadcast %109 : vector<1x128xf32> to vector<16x128xf32>
    %114 = arith.mulf %89, %113 : vector<16x128xf32>
    %115 = vector.broadcast %112 : vector<1x128xf32> to vector<16x128xf32>
    %116 = arith.addf %114, %115 : vector<16x128xf32>
    %c0_56 = arith.constant 0 : index
    %c0_57 = arith.constant 0 : index
    %117 = vector.load %arg20[%c0_56, %c0_57] : memref<128x128xbf16, #tpu.memory_space<vmem>>, vector<128x128xbf16>
    %118 = arith.truncf %116 : vector<16x128xf32> to vector<16x128xbf16>
    %cst_58 = arith.constant dense<0.000000e+00> : vector<16x128xf32>
    %119 = tpu.matmul %118, %117, %cst_58 {dimension_numbers = #tpu.dot_dimension_numbers<[1], [0], [0], [1], [0, 0, 1, 1], [], []>} : vector<16x128xbf16>, vector<128x128xbf16>, vector<16x128xf32> -> vector<16x128xf32>
    %c0_59 = arith.constant 0 : index
    %c0_60 = arith.constant 0 : index
    %120 = vector.load %arg21[%c0_59, %c0_60] : memref<1x128xf32, #tpu.memory_space<vmem>>, vector<1x128xf32>
    %121 = vector.broadcast %120 : vector<1x128xf32> to vector<16x128xf32>
    %122 = arith.addf %119, %121 : vector<16x128xf32>
    %c0_61 = arith.constant 0 : index
    %c0_62 = arith.constant 0 : index
    %123 = vector.load %arg7[%c0_61, %c0_62] : memref<16x16xbf16, #tpu.memory_space<vmem>>, vector<16x16xbf16>
    %124 = arith.truncf %122 : vector<16x128xf32> to vector<16x128xbf16>
    %cst_63 = arith.constant dense<0.000000e+00> : vector<16x128xf32>
    %125 = tpu.matmul %123, %124, %cst_63 {dimension_numbers = #tpu.dot_dimension_numbers<[1], [0], [0], [1], [0, 0, 1, 1], [], []>} : vector<16x16xbf16>, vector<16x128xbf16>, vector<16x128xf32> -> vector<16x128xf32>
    %c0_64 = arith.constant 0 : index
    %c0_65 = arith.constant 0 : index
    %126 = vector.load %arg25[%c0_64, %c0_65] : memref<16x128xf32, #tpu.memory_space<vmem>>, vector<16x128xf32>
    tpu.vector_store %arg25[%c0_64, %c0_65], %125 {strides = array<i32>} : memref<16x128xf32, #tpu.memory_space<vmem>>, vector<16x128xf32>,
    %c0_66 = arith.constant 0 : index
    %c0_67 = arith.constant 0 : index
    %127 = vector.load %arg22[%c0_66, %c0_67] : memref<128x128xbf16, #tpu.memory_space<vmem>>, vector<128x128xbf16>
    %128 = arith.truncf %125 : vector<16x128xf32> to vector<16x128xbf16>
    %cst_68 = arith.constant dense<0.000000e+00> : vector<16x128xf32>
    %129 = tpu.matmul %128, %127, %cst_68 {dimension_numbers = #tpu.dot_dimension_numbers<[1], [0], [0], [1], [0, 0, 1, 1], [], []>} : vector<16x128xbf16>, vector<128x128xbf16>, vector<16x128xf32> -> vector<16x128xf32>
    %c0_69 = arith.constant 0 : index
    %c0_70 = arith.constant 0 : index
    %130 = vector.load %arg23[%c0_69, %c0_70] : memref<1x128xf32, #tpu.memory_space<vmem>>, vector<1x128xf32>
    %131 = vector.broadcast %130 : vector<1x128xf32> to vector<16x128xf32>
    %132 = arith.addf %129, %131 : vector<16x128xf32>
    %c0_71 = arith.constant 0 : index
    %c0_72 = arith.constant 0 : index
    %133 = vector.load %arg24[%c0_71, %c0_72] : memref<16x128xf32, #tpu.memory_space<vmem>>, vector<16x128xf32>
    tpu.vector_store %arg24[%c0_71, %c0_72], %132 {strides = array<i32>} : memref<16x128xf32, #tpu.memory_space<vmem>>, vector<16x128xf32>,
    return
  }
  func.func @transform_0(%arg0: i32) -> (i32, i32) {
    %c0_i32 = arith.constant 0 : i32
    %c0_i32_0 = arith.constant 0 : i32
    %c0_i32_1 = arith.constant 0 : i32
    return %c0_i32, %c0_i32_0 : i32, i32
  }
  func.func @transform_1(%arg0: i32) -> (i32, i32) {
    %c0_i32 = arith.constant 0 : i32
    %c0_i32_0 = arith.constant 0 : i32
    %c0_i32_1 = arith.constant 0 : i32
    return %c0_i32, %c0_i32_0 : i32, i32
  }
  func.func @transform_2(%arg0: i32) -> (i32, i32) {
    %c0_i32 = arith.constant 0 : i32
    %c0_i32_0 = arith.constant 0 : i32
    %c0_i32_1 = arith.constant 0 : i32
    return %c0_i32, %c0_i32_0 : i32, i32
  }
  func.func @transform_3(%arg0: i32) -> (i32, i32) {
    %c0_i32 = arith.constant 0 : i32
    %c0_i32_0 = arith.constant 0 : i32
    %c0_i32_1 = arith.constant 0 : i32
    return %c0_i32, %c0_i32_0 : i32, i32
  }
  func.func @transform_4(%arg0: i32) -> (i32, i32) {
    %c0_i32 = arith.constant 0 : i32
    %c0_i32_0 = arith.constant 0 : i32
    %c0_i32_1 = arith.constant 0 : i32
    return %c0_i32, %c0_i32_0 : i32, i32
  }
  func.func @transform_5(%arg0: i32) -> (i32, i32) {
    %c0_i32 = arith.constant 0 : i32
    %c0_i32_0 = arith.constant 0 : i32
    %c0_i32_1 = arith.constant 0 : i32
    return %c0_i32, %c0_i32_0 : i32, i32
  }
  func.func @transform_6(%arg0: i32) -> (i32, i32) {
    %c0_i32 = arith.constant 0 : i32
    %c0_i32_0 = arith.constant 0 : i32
    %c0_i32_1 = arith.constant 0 : i32
    return %c0_i32, %c0_i32_0 : i32, i32
  }
  func.func @transform_7(%arg0: i32) -> (i32, i32) {
    %c0_i32 = arith.constant 0 : i32
    %c0_i32_0 = arith.constant 0 : i32
    %c0_i32_1 = arith.constant 0 : i32
    return %c0_i32, %c0_i32_0 : i32, i32
  }
  func.func @transform_8(%arg0: i32) -> (i32, i32) {
    %c0_i32 = arith.constant 0 : i32
    %c0_i32_0 = arith.constant 0 : i32
    %c0_i32_1 = arith.constant 0 : i32
    return %c0_i32, %c0_i32_0 : i32, i32
  }
  func.func @transform_9(%arg0: i32) -> (i32, i32) {
    %c0_i32 = arith.constant 0 : i32
    %c0_i32_0 = arith.constant 0 : i32
    %c0_i32_1 = arith.constant 0 : i32
    return %c0_i32, %c0_i32_0 : i32, i32
  }
  func.func @transform_10(%arg0: i32) -> (i32, i32) {
    %c0_i32 = arith.constant 0 : i32
    %c0_i32_0 = arith.constant 0 : i32
    %c0_i32_1 = arith.constant 0 : i32
    return %c0_i32, %c0_i32_0 : i32, i32
  }
  func.func @transform_11(%arg0: i32) -> (i32, i32) {
    %c0_i32 = arith.constant 0 : i32
    %c0_i32_0 = arith.constant 0 : i32
    %c0_i32_1 = arith.constant 0 : i32
    return %c0_i32, %c0_i32_0 : i32, i32
  }
  func.func @transform_12(%arg0: i32) -> (i32, i32) {
    %c0_i32 = arith.constant 0 : i32
    %c0_i32_0 = arith.constant 0 : i32
    %c0_i32_1 = arith.constant 0 : i32
    return %c0_i32, %c0_i32_0 : i32, i32
  }
  func.func @transform_13(%arg0: i32) -> (i32, i32) {
    %c0_i32 = arith.constant 0 : i32
    %c0_i32_0 = arith.constant 0 : i32
    %c0_i32_1 = arith.constant 0 : i32
    return %c0_i32, %c0_i32_0 : i32, i32
  }
  func.func @transform_14(%arg0: i32) -> (i32, i32) {
    %c0_i32 = arith.constant 0 : i32
    %c0_i32_0 = arith.constant 0 : i32
    %c0_i32_1 = arith.constant 0 : i32
    return %c0_i32, %c0_i32_0 : i32, i32
  }
  func.func @transform_15(%arg0: i32) -> (i32, i32) {
    %c0_i32 = arith.constant 0 : i32
    %c0_i32_0 = arith.constant 0 : i32
    %c0_i32_1 = arith.constant 0 : i32
    return %c0_i32, %c0_i32_0 : i32, i32
  }
  func.func @transform_16(%arg0: i32) -> (i32, i32) {
    %c0_i32 = arith.constant 0 : i32
    %c0_i32_0 = arith.constant 0 : i32
    %c0_i32_1 = arith.constant 0 : i32
    return %c0_i32, %c0_i32_0 : i32, i32
  }
  func.func @transform_17(%arg0: i32) -> (i32, i32) {
    %c0_i32 = arith.constant 0 : i32
    %c0_i32_0 = arith.constant 0 : i32
    %c0_i32_1 = arith.constant 0 : i32
    return %c0_i32, %c0_i32_0 : i32, i32
  }
  func.func @transform_18(%arg0: i32) -> (i32, i32) {
    %c0_i32 = arith.constant 0 : i32
    %c0_i32_0 = arith.constant 0 : i32
    %c0_i32_1 = arith.constant 0 : i32
    return %c0_i32, %c0_i32_0 : i32, i32
  }
  func.func @transform_19(%arg0: i32) -> (i32, i32) {
    %c0_i32 = arith.constant 0 : i32
    %c0_i32_0 = arith.constant 0 : i32
    %c0_i32_1 = arith.constant 0 : i32
    return %c0_i32, %c0_i32_0 : i32, i32
  }
  func.func @transform_20(%arg0: i32) -> (i32, i32) {
    %c0_i32 = arith.constant 0 : i32
    %c0_i32_0 = arith.constant 0 : i32
    %c0_i32_1 = arith.constant 0 : i32
    return %c0_i32, %c0_i32_0 : i32, i32
  }
  func.func @transform_21(%arg0: i32) -> (i32, i32) {
    %c0_i32 = arith.constant 0 : i32
    %c0_i32_0 = arith.constant 0 : i32
    %c0_i32_1 = arith.constant 0 : i32
    return %c0_i32, %c0_i32_0 : i32, i32
  }
  func.func @transform_22(%arg0: i32) -> (i32, i32) {
    %c0_i32 = arith.constant 0 : i32
    %c0_i32_0 = arith.constant 0 : i32
    %c0_i32_1 = arith.constant 0 : i32
    return %c0_i32, %c0_i32_0 : i32, i32
  }
  func.func @transform_23(%arg0: i32) -> (i32, i32) {
    %c0_i32 = arith.constant 0 : i32
    %c0_i32_0 = arith.constant 0 : i32
    %c0_i32_1 = arith.constant 0 : i32
    return %c0_i32, %c0_i32_0 : i32, i32
  }
  func.func @transform_24(%arg0: i32) -> (i32, i32) {
    %c0_i32 = arith.constant 0 : i32
    %c0_i32_0 = arith.constant 0 : i32
    %c0_i32_1 = arith.constant 0 : i32
    return %c0_i32, %c0_i32_0 : i32, i32
  }
}

</mosaic_0001>

<bundles_post_ra>
// kernel: tpu_custom_call.1
= control target key start
LH: loop header
LB: loop body
LE: loop exit
PB: predicated region body
PF: predicated region fallthrough
CT: control target
= control target key end

     0   :  { %s3355_s0 = inlined_call_operand.<no memory space> [shape: s32[1,1], index: 0, kind: input, shape index: {}]   ;;  %s3356_s1 = inlined_call_operand.hbm [shape: f32[16,24], index: 1, kind: input, shape index: {}]   ;;  %s3357_s2 = inlined_call_operand.vmem [shape: f32[1,384], index: 2, kind: input, shape index: {}]   ;;  %s3358_s3 = inlined_call_operand.vmem [shape: f32[1,384], index: 3, kind: input, shape index: {}]   ;;  %s3359_s4 = inlined_call_operand.hbm [shape: f32[24,384], index: 4, kind: input, shape index: {}]   ;;  %s3360_s5 = inlined_call_operand.hbm [shape: bf16[16,16], index: 5, kind: input, shape index: {}]   ;;  %s3361_s6 = inlined_call_operand.hbm [shape: bf16[16,16], index: 6, kind: input, shape index: {}]   ;;  %s3362_s7 = inlined_call_operand.hbm [shape: bf16[384,128], index: 7, kind: input, shape index: {}]   ;;  %s3363_s8 = inlined_call_operand.vmem [shape: f32[1,128], index: 8, kind: input, shape index: {}]   ;;  %s3364_s9 = inlined_call_operand.hbm [shape: bf16[128,128], index: 9, kind: input, shape index: {}]   ;;  %s3365_s10 = inlined_call_operand.hbm [shape: f32[1,128], index: 10, kind: input, shape index: {}]   ;;  %s3366_s11 = inlined_call_operand.hbm [shape: f32[1,128], index: 11, kind: input, shape index: {}]   ;;  %s3367_s12 = inlined_call_operand.hbm [shape: f32[1,128], index: 12, kind: input, shape index: {}]   ;;  %s3368_s13 = inlined_call_operand.hbm [shape: bf16[128,128], index: 13, kind: input, shape index: {}]   ;;  %s3369_s14 = inlined_call_operand.hbm [shape: f32[1,128], index: 14, kind: input, shape index: {}]   ;;  %s3370_s15 = inlined_call_operand.hbm [shape: bf16[128,128], index: 15, kind: input, shape index: {}]   ;;  %s3371_s16 = inlined_call_operand.hbm [shape: f32[1,128], index: 16, kind: input, shape index: {}]   ;;  %s3372_s17 = inlined_call_operand.hbm [shape: f32[1,128], index: 17, kind: input, shape index: {}]   ;;  %s3373_s18 = inlined_call_operand.hbm [shape: f32[1,128], index: 18, kind: input, shape index: {}]   ;;  %s3374_s19 = inlined_call_operand.vmem [shape: bf16[128,128], index: 19, kind: input, shape index: {}]   ;;  %s3375_s20 = inlined_call_operand.vmem [shape: f32[1,128], index: 20, kind: input, shape index: {}]   ;;  %s3376_s21 = inlined_call_operand.hbm [shape: bf16[128,128], index: 21, kind: input, shape index: {}]   ;;  %s3377_s22 = inlined_call_operand.vmem [shape: f32[1,128], index: 22, kind: input, shape index: {}]   ;;  %s3378_s23 = inlined_call_operand.hbm [shape: f32[16,128], index: 23, kind: output, shape index: {0}]   ;;  %s3379_s24 = inlined_call_operand.hbm [shape: f32[16,128], index: 24, kind: output, shape index: {1}]  }
   0x1   :  { %3388 = sst [smem:[#allocation43_spill]] %s3355_s0 }
   0x2   :  { %3389 = sst [smem:[#allocation44_spill]] %s3356_s1 }
   0x3   :  { %3390 = sst [smem:[#allocation45_spill]] %s3357_s2 }
   0x4   :  { %3391 = sst [smem:[#allocation46_spill]] %s3358_s3 }
   0x5   :  { %3392 = sst [smem:[#allocation47_spill]] %s3359_s4 }
   0x6   :  { %3393 = sst [smem:[#allocation48_spill]] %s3360_s5 }
   0x7   :  { %3394 = sst [smem:[#allocation49_spill]] %s3361_s6 }
   0x8   :  { %3395 = sst [smem:[#allocation50_spill]] %s3362_s7 }
   0x9   :  { %3396 = sst [smem:[#allocation51_spill]] %s3363_s8 }
   0xa   :  { %3397 = sst [smem:[#allocation52_spill]] %s3377_s22 }
   0xb   :  { %3398 = sst [smem:[#allocation53_spill]] %s3378_s23 }
   0xc   :  { %3399 = sst [smem:[#allocation54_spill]] %s3379_s24 }
   0xd   :  { %31 = vsyncpa [#allocation4], 0 }
   0xe   :  { %32 = vsyncpa [#allocation7], 0 }
   0xf   :  { %33 = vsyncpa [#allocation10], 0 }
  0x10   :  { %34 = vsyncpa [#allocation13], 0 }
  0x11   :  { %35 = vsyncpa [#allocation16], 0 }
  0x12   :  { %36 = vsyncpa [#allocation19], 0 }
  0x13   :  { %37 = vsyncpa [#allocation22], 0 }
  0x14   :  { %38 = vsyncpa [#allocation25], 0 }
  0x15   :  { %39 = vsyncpa [#allocation28], 0 }
  0x16   :  { %40 = vsyncpa [#allocation5], 0 }
  0x17   :  { %41 = vsyncpa [#allocation31], 0  ;;  %s2751_s5 = smov [#allocation6]   ;;  %s3400_s6 = sld [smem:[#allocation47_spill]] }
  0x18   :  { %s65_s26 = sshll.u32 %s2751_s5, 4  ;;  %s66_s26 = int_to_ptr.vmem [resolvable:$true] %s65_s26 }
  0x1d   :  { %s2333_s2 = scalar_lea.hbm %s3400_s6, 1152 }
  0x1e   :  { %p2334_p0 = scmp.ne.s32.totalorder %s3400_s6, %s2333_s2  ;;  %p2337_p1 = scmp.lt.u32.totalorder %s2333_s2, %s3400_s6 }
  0x20   :  { %p2339_p2 = pnand %p2337_p1, %p2334_p0 }
  0x22   :  { %2342 = shalt.err (!%p2339_p2)
}
  0x23   :  { %s2343_s3 = scalar_lea.vmem %s66_s26, 1152  ;;  %p2348_p4 = scmp.lt.s32.totalorder %s66_s26, %s66_s26 }
  0x24   :  { %p2344_p3 = scmp.ne.s32.totalorder %s66_s26, %s2343_s3  ;;  %p2349_p5 = scmp.lt.s32.totalorder %s2343_s3, %s2343_s3 }
  0x26   :  { %p2350_p6 = por %p2349_p5, %p2348_p4 }
  0x28   :  { %p2351_p7 = pnand %p2350_p6, %p2344_p3 }
  0x2a   :  { %2354 = shalt.err (!%p2351_p7)
}
  0x2b   :  { %s2752_s25 = smov 384   ;;  %s2753_s8 = smov 24  }
  0x2c   :  { %71 = dma.hbm_to_vmem [thread:$0]  %s3400_s6, 1152, %s66_s26, [#allocation7], %s2752_s25, %s2752_s25, %s2753_s8  }
  0x2d   :  { %s2754_s5 = smov [#allocation9]   ;;  %s2755_s28 = smov [#allocation12]  }
  0x2e   :  { %s89_s27 = sshll.u32 %s2754_s5, 4  ;;  %s115_s2 = sshll.u32 %s2755_s28, 4  ;;  %s90_s27 = int_to_ptr.vmem [resolvable:$true] %s89_s27  ;;  %s116_s2 = int_to_ptr.vmem [resolvable:$true] %s115_s2 }
  0x2f   :  { %s3401_s7 = sld [smem:[#allocation49_spill]] }
  0x35   :  { %s2355_s30 = scalar_lea.hbm %s3401_s7, 128 }
  0x36   :  { %p2356_p8 = scmp.ne.s32.totalorder %s3401_s7, %s2355_s30  ;;  %p2359_p9 = scmp.lt.u32.totalorder %s2355_s30, %s3401_s7 }
  0x38   :  { %p2361_p10 = pnand %p2359_p9, %p2356_p8 }
  0x3a   :  { %2364 = shalt.err (!%p2361_p10)
}
  0x3b   :  { %s2365_s26 = scalar_lea.vmem %s90_s27, 128  ;;  %p2370_p12 = scmp.lt.s32.totalorder %s90_s27, %s90_s27 }
  0x3c   :  { %p2366_p11 = scmp.ne.s32.totalorder %s90_s27, %s2365_s26  ;;  %p2371_p13 = scmp.lt.s32.totalorder %s2365_s26, %s2365_s26 }
  0x3e   :  { %p2372_p0 = por %p2371_p13, %p2370_p12 }
  0x40   :  { %p2373_p1 = pnand %p2372_p0, %p2366_p11 }
  0x42   :  { %2376 = shalt.err (!%p2373_p1)
}
  0x43   :  { %s2756_s6 = smov 64   ;;  %s2757_s25 = smov 4  }
  0x44   :  { %95 = dma.hbm_to_vmem [thread:$0]  %s3401_s7, 128, %s90_s27, [#allocation10], %s2756_s6, %s2756_s6, %s2757_s25  }
  0x45   :  { %s2377_s4 = scalar_lea.hbm %s3364_s9, 1024 }
  0x46   :  { %p2378_p2 = scmp.ne.s32.totalorder %s3364_s9, %s2377_s4  ;;  %p2381_p3 = scmp.lt.u32.totalorder %s2377_s4, %s3364_s9 }
  0x48   :  { %p2383_p4 = pnand %p2381_p3, %p2378_p2 }
  0x4a   :  { %2386 = shalt.err (!%p2383_p4)
}
  0x4b   :  { %s2387_s0 = scalar_lea.vmem %s116_s2, 1024  ;;  %p2392_p6 = scmp.lt.s32.totalorder %s116_s2, %s116_s2 }
  0x4c   :  { %p2388_p5 = scmp.ne.s32.totalorder %s116_s2, %s2387_s0  ;;  %p2393_p7 = scmp.lt.s32.totalorder %s2387_s0, %s2387_s0 }
  0x4e   :  { %p2394_p8 = por %p2393_p7, %p2392_p6 }
  0x50   :  { %p2395_p9 = pnand %p2394_p8, %p2388_p5 }
  0x52   :  { %2398 = shalt.err (!%p2395_p9)
}
  0x53   :  { %121 = dma.hbm_to_vmem [thread:$0]  %s3364_s9, 1024, %s116_s2, [#allocation13], %s2756_s6, %s2756_s6, %s2757_s25  }
  0x54   :  { %s2758_s30 = smov [#allocation15]   ;;  %s2759_s26 = smov [#allocation18]  }
  0x55   :  { %s138_s3 = sshll.u32 %s2758_s30, 4  ;;  %s157_s23 = sshll.u32 %s2759_s26, 4  ;;  %s139_s3 = int_to_ptr.vmem [resolvable:$true] %s138_s3  ;;  %s158_s23 = int_to_ptr.vmem [resolvable:$true] %s157_s23 }
  0x56   :  { %s2399_s24 = scalar_lea.hbm %s3366_s11, 16 }
  0x57   :  { %p2400_p10 = scmp.ne.s32.totalorder %s3366_s11, %s2399_s24  ;;  %p2403_p11 = scmp.lt.u32.totalorder %s2399_s24, %s3366_s11 }
  0x59   :  { %p2405_p12 = pnand %p2403_p11, %p2400_p10 }
  0x5b   :  { %2408 = shalt.err (!%p2405_p12)
}
  0x5c   :  { %s2409_s9 = scalar_lea.vmem %s139_s3, 16  ;;  %s2413_s2 = scalar_lea.vmem %s139_s3, 32 }
  0x5d   :  { %p2410_p13 = scmp.ne.s32.totalorder %s139_s3, %s2409_s9  ;;  %p2414_p0 = scmp.lt.s32.totalorder %s139_s3, %s139_s3 }
  0x5e   :  { %p2415_p1 = scmp.lt.s32.totalorder %s2413_s2, %s2409_s9 }
  0x60   :  { %p2416_p2 = por %p2415_p1, %p2414_p0 }
  0x62   :  { %p2417_p3 = pnand %p2416_p2, %p2410_p13 }
  0x64   :  { %2420 = shalt.err (!%p2417_p3)
}
  0x65   :  { %141 = dma.hbm_to_vmem [thread:$0]  %s3366_s11, 16, %s139_s3, [#allocation16]  }
  0x66   :  { %s2421_s30 = scalar_lea.hbm %s3368_s13, 1024 }
  0x67   :  { %p2422_p4 = scmp.ne.s32.totalorder %s3368_s13, %s2421_s30  ;;  %p2425_p5 = scmp.lt.u32.totalorder %s2421_s30, %s3368_s13 }
  0x69   :  { %p2427_p6 = pnand %p2425_p5, %p2422_p4 }
  0x6b   :  { %2430 = shalt.err (!%p2427_p6)
}
  0x6c   :  { %s2431_s4 = scalar_lea.vmem %s158_s23, 1024  ;;  %p2436_p8 = scmp.lt.s32.totalorder %s158_s23, %s158_s23 }
  0x6d   :  { %p2432_p7 = scmp.ne.s32.totalorder %s158_s23, %s2431_s4  ;;  %p2437_p9 = scmp.lt.s32.totalorder %s2431_s4, %s2431_s4 }
  0x6f   :  { %p2438_p10 = por %p2437_p9, %p2436_p8 }
  0x71   :  { %p2439_p11 = pnand %p2438_p10, %p2432_p7 }
  0x73   :  { %2442 = shalt.err (!%p2439_p11)
}
  0x74   :  { %163 = dma.hbm_to_vmem [thread:$0]  %s3368_s13, 1024, %s158_s23, [#allocation19], %s2756_s6, %s2756_s6, %s2757_s25  }
  0x75   :  { %s2760_s1 = smov [#allocation21]   ;;  %s2761_s28 = smov [#allocation24]  }
  0x76   :  { %s179_s5 = sshll.u32 %s2760_s1, 4  ;;  %s202_s9 = sshll.u32 %s2761_s28, 4  ;;  %s180_s5 = int_to_ptr.vmem [resolvable:$true] %s179_s5  ;;  %s203_s9 = int_to_ptr.vmem [resolvable:$true] %s202_s9 }
  0x77   :  { %s2443_s0 = scalar_lea.hbm %s3370_s15, 1024 }
  0x78   :  { %p2444_p12 = scmp.ne.s32.totalorder %s3370_s15, %s2443_s0  ;;  %p2447_p13 = scmp.lt.u32.totalorder %s2443_s0, %s3370_s15 }
  0x7a   :  { %p2449_p0 = pnand %p2447_p13, %p2444_p12 }
  0x7c   :  { %2452 = shalt.err (!%p2449_p0)
}
  0x7d   :  { %s2453_s13 = scalar_lea.vmem %s180_s5, 1024  ;;  %p2458_p2 = scmp.lt.s32.totalorder %s180_s5, %s180_s5 }
  0x7e   :  { %p2454_p1 = scmp.ne.s32.totalorder %s180_s5, %s2453_s13  ;;  %p2459_p3 = scmp.lt.s32.totalorder %s2453_s13, %s2453_s13 }
  0x80   :  { %p2460_p4 = por %p2459_p3, %p2458_p2 }
  0x82   :  { %p2461_p5 = pnand %p2460_p4, %p2454_p1 }
  0x84   :  { %2464 = shalt.err (!%p2461_p5)
}
  0x85   :  { %185 = dma.hbm_to_vmem [thread:$0]  %s3370_s15, 1024, %s180_s5, [#allocation22], %s2756_s6, %s2756_s6, %s2757_s25  }
  0x86   :  { %s2465_s4 = scalar_lea.hbm %s3372_s17, 16 }
  0x87   :  { %p2466_p6 = scmp.ne.s32.totalorder %s3372_s17, %s2465_s4  ;;  %p2469_p7 = scmp.lt.u32.totalorder %s2465_s4, %s3372_s17 }
  0x89   :  { %p2471_p8 = pnand %p2469_p7, %p2466_p6 }
  0x8b   :  { %2474 = shalt.err (!%p2471_p8)
}
  0x8c   :  { %s2475_s2 = scalar_lea.vmem %s203_s9, 16  ;;  %s2479_s29 = scalar_lea.vmem %s203_s9, 32 }
  0x8d   :  { %p2476_p9 = scmp.ne.s32.totalorder %s203_s9, %s2475_s2  ;;  %p2480_p10 = scmp.lt.s32.totalorder %s203_s9, %s203_s9 }
  0x8e   :  { %p2481_p11 = scmp.lt.s32.totalorder %s2479_s29, %s2475_s2 }
  0x90   :  { %p2482_p12 = por %p2481_p11, %p2480_p10 }
  0x92   :  { %p2483_p13 = pnand %p2482_p12, %p2476_p9 }
  0x94   :  { %2486 = shalt.err (!%p2483_p13)
}
  0x95   :  { %205 = dma.hbm_to_vmem [thread:$0]  %s3372_s17, 16, %s203_s9, [#allocation25]  }
  0x96   :  { %s2762_s0 = smov [#allocation3]   ;;  %s3402_s26 = sld [smem:[#allocation44_spill]] }
  0x97   :  { %s49_s27 = sshll.u32 %s2762_s0, 4  ;;  %s50_s27 = int_to_ptr.vmem [resolvable:$true] %s49_s27 }
  0x9c   :  { %s2487_s13 = scalar_lea.hbm %s3402_s26, 256 }
  0x9d   :  { %p2488_p0 = scmp.ne.s32.totalorder %s3402_s26, %s2487_s13  ;;  %p2491_p1 = scmp.lt.u32.totalorder %s2487_s13, %s3402_s26 }
  0x9f   :  { %p2493_p2 = pnand %p2491_p1, %p2488_p0 }
  0xa1   :  { %2496 = shalt.err (!%p2493_p2)
}
  0xa2   :  { %s2497_s4 = scalar_lea.vmem %s50_s27, 256  ;;  %p2502_p4 = scmp.lt.s32.totalorder %s50_s27, %s50_s27 }
  0xa3   :  { %p2498_p3 = scmp.ne.s32.totalorder %s50_s27, %s2497_s4  ;;  %p2503_p5 = scmp.lt.s32.totalorder %s2497_s4, %s2497_s4 }
  0xa5   :  { %p2504_p6 = por %p2503_p5, %p2502_p4 }
  0xa7   :  { %p2505_p7 = pnand %p2504_p6, %p2498_p3 }
  0xa9   :  { %2508 = shalt.err (!%p2505_p7)
}
  0xaa   :  { %s2763_s17 = smov 128   ;;  %s2764_s9 = smov 8  }
  0xab   :  { %55 = dma.hbm_to_vmem [thread:$0]  %s3402_s26, 256, %s50_s27, [#allocation4], %s2763_s17, %s2763_s17, %s2764_s9  }
  0xac   :  { %s2765_s1 = smov [#allocation8]   ;;  %s2766_s2 = smov [#allocation11]  }
  0xad   :  { %s77_s28 = sshll.u32 %s2765_s1, 4  ;;  %s101_s29 = sshll.u32 %s2766_s2, 4  ;;  %s78_s28 = int_to_ptr.vmem [resolvable:$true] %s77_s28  ;;  %s3014_s29 = int_to_ptr.vmem [resolvable:$true] %s101_s29 }
  0xae   :  { %s3403_s0 = sld [smem:[#allocation48_spill]] }
  0xb4   :  { %s2509_s7 = scalar_lea.hbm %s3403_s0, 128 }
  0xb5   :  { %p2510_p8 = scmp.ne.s32.totalorder %s3403_s0, %s2509_s7  ;;  %p2513_p9 = scmp.lt.u32.totalorder %s2509_s7, %s3403_s0 }
  0xb7   :  { %p2515_p10 = pnand %p2513_p9, %p2510_p8 }
  0xb9   :  { %2518 = shalt.err (!%p2515_p10)
}
  0xba   :  { %s2519_s27 = scalar_lea.vmem %s78_s28, 128  ;;  %p2524_p12 = scmp.lt.s32.totalorder %s78_s28, %s78_s28 }
  0xbb   :  { %p2520_p11 = scmp.ne.s32.totalorder %s78_s28, %s2519_s27  ;;  %p2525_p13 = scmp.lt.s32.totalorder %s2519_s27, %s2519_s27 }
  0xbd   :  { %p2526_p0 = por %p2525_p13, %p2524_p12 }
  0xbf   :  { %p2527_p1 = pnand %p2526_p0, %p2520_p11 }
  0xc1   :  { %2530 = shalt.err (!%p2527_p1)
}
  0xc2   :  { %83 = dma.hbm_to_vmem [thread:$0]  %s3403_s0, 128, %s78_s28, [#allocation7], %s2756_s6, %s2756_s6, %s2757_s25  }
  0xc3   :  { %s3404_s11 = sld [smem:[#allocation50_spill]] }
  0xc9   :  { %s2531_s3 = scalar_lea.hbm %s3404_s11, 3072 }
  0xca   :  { %p2532_p2 = scmp.ne.s32.totalorder %s3404_s11, %s2531_s3  ;;  %p2535_p3 = scmp.lt.u32.totalorder %s2531_s3, %s3404_s11 }
  0xcc   :  { %p2537_p4 = pnand %p2535_p3, %p2532_p2 }
  0xce   :  { %2540 = shalt.err (!%p2537_p4)
}
  0xcf   :  { %s2541_s7 = scalar_lea.vmem %s3014_s29, 3072  ;;  %p2546_p6 = scmp.lt.s32.totalorder %s3014_s29, %s3014_s29 }
  0xd0   :  { %p2542_p5 = scmp.ne.s32.totalorder %s3014_s29, %s2541_s7  ;;  %p2547_p7 = scmp.lt.s32.totalorder %s2541_s7, %s2541_s7 }
  0xd2   :  { %p2548_p8 = por %p2547_p7, %p2546_p6 }
  0xd4   :  { %p2549_p9 = pnand %p2548_p8, %p2542_p5 }
  0xd6   :  { %2552 = shalt.err (!%p2549_p9)
}
  0xd7   :  { %107 = dma.hbm_to_vmem [thread:$0]  %s3404_s11, 3072, %s3014_s29, [#allocation10], %s2756_s6, %s2756_s6, %s2757_s25  }
  0xd8   :  { %s2767_s30 = smov [#allocation14]   ;;  %s2768_s23 = smov [#allocation17]  }
  0xd9   :  { %s128_s13 = sshll.u32 %s2767_s30, 4  ;;  %s148_s8 = sshll.u32 %s2768_s23, 4  ;;  %s129_s13 = int_to_ptr.vmem [resolvable:$true] %s128_s13  ;;  %s149_s8 = int_to_ptr.vmem [resolvable:$true] %s148_s8 }
  0xda   :  { %s2553_s22 = scalar_lea.hbm %s3365_s10, 16 }
  0xdb   :  { %p2554_p10 = scmp.ne.s32.totalorder %s3365_s10, %s2553_s22  ;;  %p2557_p11 = scmp.lt.u32.totalorder %s2553_s22, %s3365_s10 }
  0xdd   :  { %p2559_p12 = pnand %p2557_p11, %p2554_p10 }
  0xdf   :  { %2562 = shalt.err (!%p2559_p12)
}
  0xe0   :  { %s2563_s29 = scalar_lea.vmem %s129_s13, 16  ;;  %s2567_s11 = scalar_lea.vmem %s129_s13, 32 }
  0xe1   :  { %p2564_p13 = scmp.ne.s32.totalorder %s129_s13, %s2563_s29  ;;  %p2568_p0 = scmp.lt.s32.totalorder %s129_s13, %s129_s13 }
  0xe2   :  { %p2569_p1 = scmp.lt.s32.totalorder %s2567_s11, %s2563_s29 }
  0xe4   :  { %p2570_p2 = por %p2569_p1, %p2568_p0 }
  0xe6   :  { %p2571_p3 = pnand %p2570_p2, %p2564_p13 }
  0xe8   :  { %2574 = shalt.err (!%p2571_p3)
}
  0xe9   :  { %131 = dma.hbm_to_vmem [thread:$0]  %s3365_s10, 16, %s129_s13, [#allocation13]  }
  0xea   :  { %s2575_s28 = scalar_lea.hbm %s3367_s12, 16 }
  0xeb   :  { %p2576_p4 = scmp.ne.s32.totalorder %s3367_s12, %s2575_s28  ;;  %p2579_p5 = scmp.lt.u32.totalorder %s2575_s28, %s3367_s12 }
  0xed   :  { %p2581_p6 = pnand %p2579_p5, %p2576_p4 }
  0xef   :  { %2584 = shalt.err (!%p2581_p6)
}
  0xf0   :  { %s2585_s26 = scalar_lea.vmem %s149_s8, 16  ;;  %s2589_s22 = scalar_lea.vmem %s149_s8, 32 }
  0xf1   :  { %p2586_p7 = scmp.ne.s32.totalorder %s149_s8, %s2585_s26  ;;  %p2590_p8 = scmp.lt.s32.totalorder %s149_s8, %s149_s8 }
  0xf2   :  { %p2591_p9 = scmp.lt.s32.totalorder %s2589_s22, %s2585_s26 }
  0xf4   :  { %p2592_p10 = por %p2591_p9, %p2590_p8 }
  0xf6   :  { %p2593_p11 = pnand %p2592_p10, %p2586_p7 }
  0xf8   :  { %2596 = shalt.err (!%p2593_p11)
}
  0xf9   :  { %151 = dma.hbm_to_vmem [thread:$0]  %s3367_s12, 16, %s149_s8, [#allocation16]  }
  0xfa   :  { %s2769_s24 = smov [#allocation20]   ;;  %s2770_s3 = smov [#allocation23]  }
  0xfb   :  { %s170_s4 = sshll.u32 %s2769_s24, 4  ;;  %s192_s1 = sshll.u32 %s2770_s3, 4  ;;  %s171_s4 = int_to_ptr.vmem [resolvable:$true] %s170_s4  ;;  %s193_s1 = int_to_ptr.vmem [resolvable:$true] %s192_s1 }
  0xfc   :  { %s2597_s2 = scalar_lea.hbm %s3369_s14, 16 }
  0xfd   :  { %p2598_p12 = scmp.ne.s32.totalorder %s3369_s14, %s2597_s2  ;;  %p2601_p13 = scmp.lt.u32.totalorder %s2597_s2, %s3369_s14 }
  0xff   :  { %p2603_p0 = pnand %p2601_p13, %p2598_p12 }
 0x101   :  { %2606 = shalt.err (!%p2603_p0)
}
 0x102   :  { %s2607_s12 = scalar_lea.vmem %s171_s4, 16  ;;  %s2611_s8 = scalar_lea.vmem %s171_s4, 32 }
 0x103   :  { %p2608_p1 = scmp.ne.s32.totalorder %s171_s4, %s2607_s12  ;;  %p2612_p2 = scmp.lt.s32.totalorder %s171_s4, %s171_s4 }
 0x104   :  { %p2613_p3 = scmp.lt.s32.totalorder %s2611_s8, %s2607_s12 }
 0x106   :  { %p2614_p4 = por %p2613_p3, %p2612_p2 }
 0x108   :  { %p2615_p5 = pnand %p2614_p4, %p2608_p1 }
 0x10a   :  { %2618 = shalt.err (!%p2615_p5)
}
 0x10b   :  { %173 = dma.hbm_to_vmem [thread:$0]  %s3369_s14, 16, %s171_s4, [#allocation19]  }
 0x10c   :  { %s2619_s26 = scalar_lea.hbm %s3371_s16, 16 }
 0x10d   :  { %p2620_p6 = scmp.ne.s32.totalorder %s3371_s16, %s2619_s26  ;;  %p2623_p7 = scmp.lt.u32.totalorder %s2619_s26, %s3371_s16 }
 0x10f   :  { %p2625_p8 = pnand %p2623_p7, %p2620_p6 }
 0x111   :  { %2628 = shalt.err (!%p2625_p8)
}
 0x112   :  { %s2629_s3 = scalar_lea.vmem %s193_s1, 16  ;;  %s2633_s29 = scalar_lea.vmem %s193_s1, 32 }
 0x113   :  { %p2630_p9 = scmp.ne.s32.totalorder %s193_s1, %s2629_s3  ;;  %p2634_p10 = scmp.lt.s32.totalorder %s193_s1, %s193_s1 }
 0x114   :  { %p2635_p11 = scmp.lt.s32.totalorder %s2633_s29, %s2629_s3 }
 0x116   :  { %p2636_p12 = por %p2635_p11, %p2634_p10 }
 0x118   :  { %p2637_p13 = pnand %p2636_p12, %p2630_p9 }
 0x11a   :  { %2640 = shalt.err (!%p2637_p13)
}
 0x11b   :  { %195 = dma.hbm_to_vmem [thread:$0]  %s3371_s16, 16, %s193_s1, [#allocation22]  }
 0x11c   :  { %s2771_s11 = smov [#allocation26]   ;;  %s2772_s15 = smov [#allocation27]  }
 0x11d   :  { %s212_s2 = sshll.u32 %s2771_s11, 4  ;;  %s225_s5 = sshll.u32 %s2772_s15, 4  ;;  %s213_s2 = int_to_ptr.vmem [resolvable:$true] %s212_s2  ;;  %s3099_s5 = int_to_ptr.vmem [resolvable:$true] %s225_s5 }
 0x11e   :  { %s2641_s12 = scalar_lea.hbm %s3373_s18, 16 }
 0x11f   :  { %p2642_p0 = scmp.ne.s32.totalorder %s3373_s18, %s2641_s12  ;;  %p2645_p1 = scmp.lt.u32.totalorder %s2641_s12, %s3373_s18 }
 0x121   :  { %p2647_p2 = pnand %p2645_p1, %p2642_p0 }
 0x123   :  { %2650 = shalt.err (!%p2647_p2)
}
 0x124   :  { %s2651_s16 = scalar_lea.vmem %s213_s2, 16  ;;  %s2655_s1 = scalar_lea.vmem %s213_s2, 32 }
 0x125   :  { %p2652_p3 = scmp.ne.s32.totalorder %s213_s2, %s2651_s16  ;;  %p2656_p4 = scmp.lt.s32.totalorder %s213_s2, %s213_s2 }
 0x126   :  { %p2657_p5 = scmp.lt.s32.totalorder %s2655_s1, %s2651_s16 }
 0x128   :  { %p2658_p6 = por %p2657_p5, %p2656_p4 }
 0x12a   :  { %p2659_p7 = pnand %p2658_p6, %p2652_p3 }
 0x12c   :  { %2662 = shalt.err (!%p2659_p7)
}
 0x12d   :  { %215 = dma.hbm_to_vmem [thread:$0]  %s3373_s18, 16, %s213_s2, [#allocation25]  }
 0x12e   :  { %s2663_s13 = scalar_lea.hbm %s3376_s21, 1024 }
 0x12f   :  { %p2664_p8 = scmp.ne.s32.totalorder %s3376_s21, %s2663_s13  ;;  %p2667_p9 = scmp.lt.u32.totalorder %s2663_s13, %s3376_s21 }
 0x131   :  { %p2669_p10 = pnand %p2667_p9, %p2664_p8 }
 0x133   :  { %2672 = shalt.err (!%p2669_p10)
}
 0x134   :  { %s2673_s4 = scalar_lea.vmem %s3099_s5, 1024  ;;  %p2678_p12 = scmp.lt.s32.totalorder %s3099_s5, %s3099_s5 }
 0x135   :  { %p2674_p11 = scmp.ne.s32.totalorder %s3099_s5, %s2673_s4  ;;  %p2679_p13 = scmp.lt.s32.totalorder %s2673_s4, %s2673_s4 }
 0x137   :  { %p2680_p0 = por %p2679_p13, %p2678_p12 }
 0x139   :  { %p2681_p1 = pnand %p2680_p0, %p2674_p11 }
 0x13b   :  { %2684 = shalt.err (!%p2681_p1)
}
 0x13c   :  { %231 = dma.hbm_to_vmem [thread:$0]  %s3376_s21, 1024, %s3099_s5, [#allocation28], %s2756_s6, %s2756_s6, %s2757_s25  }
 0x13d   :  { %2729 = dma.done.wait [#allocation4], 256  }
 0x13e   :  { %2730 = vsyncadd [#allocation4], 4294967040 }
 0x13f   :  { %2731 = dma.done.wait [#allocation7], 1280  }
 0x140   :  { %2732 = vsyncadd [#allocation7], 4294966016 }
 0x141   :  { %2733 = dma.done.wait [#allocation10], 3200  }
 0x142   :  { %2734 = vsyncadd [#allocation10], 4294964096 }
 0x143   :  { %2735 = dma.done.wait [#allocation13], 1040  }
 0x144   :  { %2736 = vsyncadd [#allocation13], 4294966256 }
 0x145   :  { %2737 = dma.done.wait [#allocation16], 32  }
 0x146   :  { %2738 = vsyncadd [#allocation16], 4294967264 }
 0x147   :  { %2739 = dma.done.wait [#allocation19], 1040  }
 0x148   :  { %2740 = vsyncadd [#allocation19], 4294966256 }
 0x149   :  { %2741 = dma.done.wait [#allocation22], 1040  }
 0x14a   :  { %2742 = vsyncadd [#allocation22], 4294966256 }
 0x14b   :  { %2743 = dma.done.wait [#allocation25], 32  }
 0x14c   :  { %2744 = vsyncadd [#allocation25], 4294967264 }
 0x14d   :  { %2745 = dma.done.wait [#allocation28], 1024  }
 0x14e   :  { %2746 = vsyncadd [#allocation28], 4294966272  ;;  %v2773_v0 = vmov 0.0   ;;  %v294_v1 = vld [vmem:[#allocation6 + $0x8] sm:$0xff]  ;;  %v297_v2 = vld [vmem:[#allocation6 + $0x20] sm:$0xff]  ;;  %vm302_vm0 = vcmask 195584   ;;  %v285_v16 = vlaneseq }
 0x14f   :  { %373 = vmatprep.mubr.f32.mxu0 %v2773_v0  ;;  %v293_v3 = vld [vmem:[#allocation6] sm:$0xff]  ;;  %v2214_v4 = vpack.c.bf16 %v297_v2, %v294_v1  ;;  %v296_v5 = vld [vmem:[#allocation6 + $0x18] sm:$0xff]  ;;  %v295_v8 = vld [vmem:[#allocation6 + $0x10] sm:$0xff]  ;;  %v2774_v15 = vmov 0   ;;  %vm2775_vm1 = vmmov 0   ;;  %s3405_s25 = sld [smem:[#allocation45_spill]] }
 0x150   :  { %v2216_v6 = vpack.c.bf16 %v296_v5, %v293_v3  ;;  %v300_v7 = vld [vmem:[#allocation6 + $0x38] sm:$0xff]  ;;  %v298_v9 = vld [vmem:[#allocation6 + $0x28] sm:$0xff]  ;;  %v299_v10 = vld [vmem:[#allocation6 + $0x30] sm:$0xff]  ;;  %575 = vmatprep.mubr.bf16.mxu1 %v2774_v15  ;;  %v464_v17 = vshrl.u32 %v285_v16, 7  ;;  %s3406_s5 = sld [smem:[#allocation46_spill]]  ;;  %vm539_vm2 = vcmask 130048  }
 0x151   :  { %2215 = vmatprep.subr.bf16.mxu0 %v2214_v4  ;;  %v291_v11 = vld [vmem:[#allocation3] sm:$0xff]  ;;  %v2218_v12 = vpack.c.bf16 %v298_v9, %v295_v8  ;;  %v301_v13 = vld [vmem:[#allocation6 + $0x40] sm:$0xff]  ;;  %v292_v14 = vld [vmem:[#allocation3 + $0x8] sm:$0xff]  ;;  %s3407_s12 = sld [smem:[#allocation51_spill]] }
 0x152   :  { %2217 = vmatpush1.bf16.msra.mxu0 %v2216_v6  ;;  %v3143_v18 = vsub.s32 0, %v464_v17  ;;  %v469_v20 = vsub.s32 1, %v464_v17  ;;  %v473_v27 = vsub.s32 2, %v464_v17  ;;  %v2252_v15 = vld [vmem:[#allocation11 + $0x80] sm:$0xff]   ;;  %v2254_v17 = vld [vmem:[#allocation11 + $0x8] sm:$0xff]   ;;  %s3408_s30 = sld [smem:[#allocation43_spill]] }
 0x153   :  { %313 = vmatprep.subr.mxu0 %v300_v7  ;;  %v2250_v7 = vld [vmem:[#allocation11 + $0x40] sm:$0xff]  }
 0x155   :  { %v461_v19 = vld [vmem:[%s3405_s25] sm:$0x7] }
 0x156   :  { %314 = vmatpush1.msra.mxu0 %v299_v10  ;;  %v466_v21 = vrot.slane %v461_v19, %v3143_v18  ;;  %v470_v22 = vrot.slane %v461_v19, %v469_v20  ;;  %v496_v25 = vld [vmem:[%s3406_s5] sm:$0x7]  ;;  %v474_v37 = vrot.slane %v461_v19, %v473_v27  ;;  %v3167_v10 = vld [vmem:[#allocation8] sm:$0xff]  }
 0x157   :  { %1863 = vmatmul.mubr.msk.f32.vlgmr.msra.gmra.mrb[0].mxu0 %vm302_vm0, %v291_v11  ;;  %2219 = vmatprep.subr.bf16.mxu0 %v2218_v12  ;;  %v505_v31 = vrot.slane %v496_v25, %v469_v20  ;;  %v501_v34 = vrot.slane %v496_v25, %v3143_v18  ;;  %v509_v53 = vrot.slane %v496_v25, %v473_v27  ;;  %v2256_v19 = vld [vmem:[#allocation11 + $0x50] sm:$0xff]   ;;  %v2255_v20 = vld [vmem:[#allocation11 + $0x88] sm:$0xff]   ;;  %v2262_v25 = vld [vmem:[#allocation11 + $0x60] sm:$0xff]  }
 0x158   :  { %379 = vmatprep.mubr.f32.mxu0 %v2773_v0  ;;  %2221 = vmatpush3.bf16.msra.mxu0 %v2218_v12  ;;  %v2251_v12 = vld [vmem:[#allocation11] sm:$0xff]   ;;  %s284_s1 = scvt.s32.f32 %s3408_s30 }
 0x159   :  { %2047 = vmatprep.subr.mxu0 %v301_v13  ;;  %v2263_v27 = vld [vmem:[#allocation11 + $0x20] sm:$0xff]  }
 0x15b   :  { %1864 = vmatmul.mubr.msk.f32.gmra.mrb[2].mxu0 %vm302_vm0, %v292_v14 }
 0x15c   :  { %2048 = vmatpush3.msra.mxu0 %v301_v13  ;;  %2049 = vmatprep.mubr.msk.f32.mxu0 %vm302_vm0, %v291_v11 }
 0x15d   :  { %2052 = vmatprep.subr.bf16.mxu0 %v2773_v0 }
 0x15f   :  { %2050 = vmatmul.mubr.msk.f32.vlgmr.msra.gmra.mrb[4].mxu0 %vm302_vm0, %v292_v14  ;;  %v2253_v14 = vld [vmem:[#allocation11 + $0x48] sm:$0xff]  }
 0x160   :  { %2054 = vmatprep.mubr.msk.bf16.mxu0 %vm2775_vm1, %v2773_v0 }
 0x22a   :  { %v375_v23 = vpop.f32.mrb[0].mxu0 }
 0x22b   :  { %v478_v24 = vsub.f32 %v375_v23, %v466_v21  ;;  %v377_v26 = vpop.f32.mrb[1].mxu0  ;;  %v2258_v23 = vld [vmem:[#allocation11 + $0x90] sm:$0xff]  }
 0x22c   :  { %v479_v28 = vsub.f32 %v377_v26, %v470_v22  ;;  %v2261_v26 = vld [vmem:[#allocation11 + $0x98] sm:$0xff]  }
 0x22d   :  { %v484_v29 = vmul.f32 %v478_v24, %v478_v24  ;;  %v2260_v24 = vld [vmem:[#allocation11 + $0x18] sm:$0xff]  }
 0x22e   :  { %v485_v30 = vmul.f32 %v479_v28, %v479_v28  ;;  %v381_v32 = vpop.f32.mrb[2].mxu0  ;;  %v2265_v28 = vld [vmem:[#allocation11 + $0x68] sm:$0xff]  }
 0x22f   :  { %v490_v33 = vsub.f32 0.0, %v484_v29  ;;  %v481_v35 = vsub.f32 %v381_v32, %v466_v21  ;;  %v383_v36 = vpop.f32.mrb[3].mxu0  ;;  %v2257_v21 = vld [vmem:[#allocation11 + $0x10] sm:$0xff]   ;;  %v2264_v29 = vld [vmem:[#allocation11 + $0xa0] sm:$0xff]  }
 0x230   :  { %v491_v38 = vsub.f32 0.0, %v485_v30  ;;  %v482_v39 = vsub.f32 %v383_v36, %v470_v22  ;;  %v2259_v22 = vld [vmem:[#allocation11 + $0x58] sm:$0xff]   ;;  %v2266_v30 = vld [vmem:[#allocation11 + $0x28] sm:$0xff]   ;;  %v2268_v32 = vld [vmem:[#allocation11 + $0x70] sm:$0xff]  }
 0x231   :  { %v487_v40 = vmul.f32 %v481_v35, %v481_v35  ;;  %v513_v44 = vmul.f32 %v501_v34, %v490_v33  ;;  %v2269_v33 = vld [vmem:[#allocation11 + $0x30] sm:$0xff]   ;;  %v2271_v35 = vld [vmem:[#allocation11 + $0x78] sm:$0xff]  }
 0x232   :  { %v514_v41 = vmul.f32 %v505_v31, %v491_v38  ;;  %v488_v42 = vmul.f32 %v482_v39, %v482_v39  ;;  %v2051_v43 = vpop.f32.mrb[4].mxu0  ;;  %v2272_v36 = vld [vmem:[#allocation11 + $0x38] sm:$0xff]  }
 0x233   :  { %v493_v45 = vsub.f32 0.0, %v487_v40  ;;  %v483_v46 = vsub.f32 %v2051_v43, %v474_v37  ;;  %v452_v47 = vpop.f32.mrb[5].mxu0  ;;  %v519_v56 = vmul.f32 1.442695, %v513_v44 }
 0x234   :  { %v521_v48 = vmul.f32 1.442695, %v514_v41  ;;  %v494_v49 = vsub.f32 0.0, %v488_v42  ;;  %v480_v50 = vsub.f32 %v452_v47, %v474_v37  ;;  %v2273_v37 = vld [vmem:[#allocation11 + $0xb8] sm:$0xff]  }
 0x235   :  { %v516_v51 = vmul.f32 %v501_v34, %v493_v45  ;;  %v489_v52 = vmul.f32 %v483_v46, %v483_v46  ;;  %v2270_v34 = vld [vmem:[#allocation11 + $0xb0] sm:$0xff]  }
 0x236   :  { %v517_v54 = vmul.f32 %v505_v31, %v494_v49  ;;  %v486_v55 = vmul.f32 %v480_v50, %v480_v50  ;;  %2315 = vpow2.f32 %v521_v48  ;;  %v2267_v31 = vld [vmem:[#allocation11 + $0xa8] sm:$0xff]  }
 0x237   :  { %v525_v57 = vmul.f32 1.442695, %v516_v51  ;;  %v495_v58 = vsub.f32 0.0, %v489_v52 }
 0x238   :  { %v527_v59 = vmul.f32 1.442695, %v517_v54  ;;  %v492_v60 = vsub.f32 0.0, %v486_v55  ;;  %v2274_v54 = vld [vmem:[#allocation12] sm:$0xff]  }
 0x239   :  { %2317 = vpow2.f32 %v525_v57  ;;  %v518_v61 = vmul.f32 %v509_v53, %v495_v58  ;;  %v2276_v57 = vld [vmem:[#allocation12 + $0x10] sm:$0xff]   ;;  %v2277_v58 = vld [vmem:[#allocation12 + $0x18] sm:$0xff]  }
 0x23a   :  { %2319 = vpow2.f32 %v527_v59  ;;  %v515_v62 = vmul.f32 %v509_v53, %v492_v60  ;;  %v2278_v59 = vld [vmem:[#allocation12 + $0x20] sm:$0xff]   ;;  %v2279_v60 = vld [vmem:[#allocation12 + $0x28] sm:$0xff]  }
 0x23b   :  { %2321 = vpow2.f32 %v519_v56  ;;  %v529_v63 = vmul.f32 1.442695, %v518_v61  ;;  %v2275_v56 = vld [vmem:[#allocation12 + $0x8] sm:$0xff]   ;;  %v2280_v61 = vld [vmem:[#allocation12 + $0x30] sm:$0xff]  }
 0x23c   :  { %v523_v1 = vmul.f32 1.442695, %v515_v62  ;;  %v2281_v62 = vld [vmem:[#allocation12 + $0x38] sm:$0xff]  }
 0x23d   :  { %2323 = vpow2.f32 %v529_v63 }
 0x23e   :  { %2325 = vpow2.f32 %v523_v1 }
 0x240   :  { %v3153_v2 = vpop.eup %2315 }
 0x243   :  { %v3155_v3 = vpop.eup %2317 }
 0x244   :  { %v3157_v4 = vpop.eup %2319 }
 0x245   :  { %v3159_v5 = vpop.eup %2321  ;;  %v532_v6 = vpack.c.bf16 %v3157_v4, %v3153_v2 }
 0x246   :  { %v531_v8 = vpack.c.bf16 %v3155_v3, %v3159_v5 }
 0x247   :  { %v3165_v9 = vpop.eup %2323  ;;  %543 = vmatprep.subr.bf16.mxu1 %v532_v6 }
 0x248   :  { %v3169_v11 = vpop.eup %2325  ;;  %544 = vmatpush1.bf16.msra.mxu1 %v531_v8 }
 0x249   :  { %v533_v13 = vpack.c.bf16 %v3165_v9, %v3169_v11  ;;  %1955 = vmatprep.subr.bf16.mxu1 %v2250_v7 }
 0x24b   :  { %1868 = vmatmul.mubr.msk.bf16.vlgmr.msra.gmra.mrb[0].mxu1 %vm539_vm2, %v3167_v10  ;;  %2053 = vmatpush3.bf16.msra.mxu0 %v533_v13 }
 0x24c   :  { %1956 = vmatpush3.bf16.msra.mxu1 %v2251_v12  ;;  %2058 = vmatprep.subr.bf16.mxu0 %v2773_v0 }
 0x24d   :  { %1957 = vmatprep.subr.bf16.mxu1 %v2253_v14 }
 0x24e   :  { %2055 = vmatmul.mubr.msk.bf16.vlgmr.msra.gmra.mrb[8].mxu0 %vm539_vm2, %v3167_v10 }
 0x24f   :  { %2059 = vmatpush3.bf16.msra.mxu0 %v2252_v15  ;;  %2074 = vmatprep.mubr.msk.bf16.mxu0 %vm2775_vm1, %v2773_v0 }
 0x250   :  { %1958 = vmatpush3.bf16.msra.mxu1 %v2254_v17  ;;  %2060 = vmatprep.subr.bf16.mxu0 %v2773_v0 }
 0x251   :  { %1959 = vmatprep.subr.bf16.mxu1 %v2256_v19 }
 0x253   :  { %2061 = vmatpush3.bf16.msra.mxu0 %v2255_v20 }
 0x254   :  { %1960 = vmatpush3.bf16.msra.mxu1 %v2257_v21  ;;  %2062 = vmatprep.subr.bf16.mxu0 %v2773_v0  ;;  %v1895_v21 = vld [vmem:[#allocation14] ss:$0 sm:$0xff] }
 0x255   :  { %1961 = vmatprep.subr.bf16.mxu1 %v2259_v22  ;;  %v286_v22 = vand.u32 127, %v285_v16 }
 0x257   :  { %2063 = vmatpush3.bf16.msra.mxu0 %v2258_v23  ;;  %v287_v23 = vstv %s3408_s30 }
 0x258   :  { %1962 = vmatpush3.bf16.msra.mxu1 %v2260_v24  ;;  %2064 = vmatprep.subr.bf16.mxu0 %v2773_v0  ;;  %vm288_vm3 = vcmp.lt.s32.totalorder %v286_v22, %v287_v23 }
 0x259   :  { %1963 = vmatprep.subr.bf16.mxu1 %v2262_v25 }
 0x25b   :  { %2065 = vmatpush3.bf16.msra.mxu0 %v2261_v26 }
 0x25c   :  { %1964 = vmatpush3.bf16.msra.mxu1 %v2263_v27  ;;  %2066 = vmatprep.subr.bf16.mxu0 %v2773_v0 }
 0x25d   :  { %1965 = vmatprep.subr.bf16.mxu1 %v2265_v28 }
 0x25f   :  { %2067 = vmatpush3.bf16.msra.mxu0 %v2264_v29 }
 0x260   :  { %1966 = vmatpush3.bf16.msra.mxu1 %v2266_v30  ;;  %2068 = vmatprep.subr.bf16.mxu0 %v2773_v0 }
 0x261   :  { %1967 = vmatprep.subr.bf16.mxu1 %v2268_v32  ;;  %v1904_v32 = vsel %vm288_vm3, 1.0, %v2773_v0 }
 0x263   :  { %2069 = vmatpush3.bf16.msra.mxu0 %v2267_v31 }
 0x264   :  { %2070 = vmatprep.subr.bf16.mxu0 %v2773_v0  ;;  %1968 = vmatpush3.bf16.msra.mxu1 %v2269_v33 }
 0x265   :  { %1969 = vmatprep.subr.bf16.mxu1 %v2271_v35  ;;  %v3217_v35 = vpack.c.bf16 %v1904_v32, %v1904_v32 }
 0x267   :  { %2071 = vmatpush3.bf16.msra.mxu0 %v2270_v34 }
 0x268   :  { %2072 = vmatprep.subr.bf16.mxu0 %v2773_v0  ;;  %1970 = vmatpush3.bf16.msra.mxu1 %v2272_v36 }
 0x269   :  { %2078 = vmatprep.subr.bf16.mxu1 %v2773_v0 }
 0x26b   :  { %2073 = vmatpush3.bf16.msra.mxu0 %v2273_v37  ;;  %v1124_v37 = vstv %s284_s1 }
 0x26c   :  { %2098 = vmatprep.subr.bf16.mxu0 %v2773_v0  ;;  %2327 = vrcp.f32 %v1124_v37 }
 0x31e   :  { %v577_v38 = vpop.f32.mrb[0].mxu1 }
 0x31f   :  { %v579_v39 = vpop.f32.mrb[1].mxu1  ;;  %v627_v41 = vadd.f32 %v3159_v5, %v577_v38 }
 0x320   :  { %v581_v40 = vpop.f32.mrb[2].mxu1  ;;  %v628_v45 = vadd.f32 %v3153_v2, %v579_v39  ;;  %v1870_v2 = vld [vmem:[%s3407_s12] ss:$0 sm:$0xff] }
 0x321   :  { %v630_v42 = vadd.f32 %v3155_v3, %v581_v40  ;;  %v583_v43 = vpop.f32.mrb[3].mxu1  ;;  %v620_v44 = vpop.f32.mrb[8].mxu0 }
 0x322   :  { %v631_v46 = vadd.f32 %v3157_v4, %v583_v43  ;;  %v2056_v47 = vpop.f32.mrb[9].mxu0  ;;  %v629_v51 = vadd.f32 %v3169_v11, %v620_v44  ;;  %v3232_v40 = vpop.eup %2327 }
 0x323   :  { %v681_v48 = vpack.c.bf16 %v630_v42, %v627_v41  ;;  %v623_v49 = vpop.f32.mrb[10].mxu0 }
 0x324   :  { %v682_v50 = vpack.c.bf16 %v631_v46, %v628_v45  ;;  %v632_v52 = vadd.f32 %v3165_v9, %v623_v49  ;;  %v2057_v53 = vpop.f32.mrb[11].mxu0 }
 0x325   :  { %v1131_v53 = vld [vmem:[#allocation15] sm:$0x1] }
 0x326   :  { %v683_v55 = vpack.c.bf16 %v632_v52, %v629_v51  ;;  %867 = vmatprep.mubr.bf16.mxu1 %v682_v50 }
 0x327   :  { %868 = vmatmul.mubr.bf16.vlgmr.msra.gmra.mrb[4].mxu1 %v681_v48 }
 0x328   :  { %2075 = vmatmul.mubr.bf16.vlgmr.msra.gmra.mrb[12].mxu0 %v683_v55  ;;  %2079 = vmatpush3.bf16.msra.mxu1 %v2274_v54 }
 0x329   :  { %2080 = vmatprep.subr.bf16.mxu1 %v2773_v0  ;;  %2094 = vmatprep.mubr.msk.bf16.mxu1 %vm2775_vm1, %v2773_v0 }
 0x32a   :  { %2100 = vmatprep.mubr.msk.bf16.mxu0 %vm2775_vm1, %v2773_v0 }
 0x32c   :  { %2081 = vmatpush3.bf16.msra.mxu1 %v2275_v56  ;;  %v1135_v56 = vld [vmem:[#allocation17] sm:$0x1] }
 0x32d   :  { %2082 = vmatprep.subr.bf16.mxu1 %v2773_v0 }
 0x330   :  { %2083 = vmatpush3.bf16.msra.mxu1 %v2276_v57 }
 0x331   :  { %2084 = vmatprep.subr.bf16.mxu1 %v2773_v0 }
 0x334   :  { %2085 = vmatpush3.bf16.msra.mxu1 %v2277_v58 }
 0x335   :  { %2086 = vmatprep.subr.bf16.mxu1 %v2773_v0 }
 0x338   :  { %2087 = vmatpush3.bf16.msra.mxu1 %v2278_v59 }
 0x339   :  { %2088 = vmatprep.subr.bf16.mxu1 %v2773_v0 }
 0x33c   :  { %2089 = vmatpush3.bf16.msra.mxu1 %v2279_v60 }
 0x33d   :  { %2090 = vmatprep.subr.bf16.mxu1 %v2773_v0 }
 0x340   :  { %2091 = vmatpush3.bf16.msra.mxu1 %v2280_v61 }
 0x341   :  { %2092 = vmatprep.subr.bf16.mxu1 %v2773_v0 }
 0x344   :  { %2093 = vmatpush3.bf16.msra.mxu1 %v2281_v62 }
 0x345   :  { %2136 = vmatprep.subr.bf16.mxu1 %v2773_v0 }
 0x3fa   :  { %v1971_v63 = vpop.f32.mrb[4].mxu1 }
 0x3fb   :  { %v1972_v1 = vpop.f32.mrb[5].mxu1  ;;  %v910_v3 = vpop.f32.mrb[12].mxu0 }
 0x3fc   :  { %v1973_v4 = vadd.f32 %v1972_v1, %v1971_v63  ;;  %v1974_v5 = vpop.f32.mrb[6].mxu1  ;;  %v2076_v6 = vpop.f32.mrb[13].mxu0 }
 0x3fd   :  { %v1975_v7 = vpop.f32.mrb[7].mxu1  ;;  %v913_v8 = vpop.f32.mrb[14].mxu0  ;;  %v2285_v6 = vld [vmem:[#allocation18 + $0x18] sm:$0xff]  }
 0x3fe   :  { %v870_v9 = vadd.f32 %v1973_v4, %v1870_v2  ;;  %v1976_v11 = vadd.f32 %v1975_v7, %v1974_v5  ;;  %v2077_v12 = vpop.f32.mrb[15].mxu0  ;;  %v2283_v4 = vld [vmem:[#allocation18 + $0x8] sm:$0xff]   ;;  %v2284_v5 = vld [vmem:[#allocation18 + $0x10] sm:$0xff]   ;;  %v2286_v7 = vld [vmem:[#allocation18 + $0x20] sm:$0xff]  }
 0x3ff   :  { %v2291_v12 = vld [vmem:[#allocation21 + $0x8] sm:$0xff]  }
 0x400   :  { %v911_v13 = vadd.f32 %v910_v3, %v870_v9  ;;  %v873_v14 = vadd.f32 %v1976_v11, %v1870_v2  ;;  %v2282_v3 = vld [vmem:[#allocation18] sm:$0xff]   ;;  %v2289_v9 = vld [vmem:[#allocation18 + $0x38] sm:$0xff]  }
 0x401   :  { %v2290_v11 = vld [vmem:[#allocation21] sm:$0xff]  }
 0x402   :  { %v914_v15 = vadd.f32 %v913_v8, %v873_v14  ;;  %v917_v17 = vmax.f32 %v911_v13, 0.0  ;;  %v2288_v8 = vld [vmem:[#allocation18 + $0x30] sm:$0xff]   ;;  %v2293_v14 = vld [vmem:[#allocation21 + $0x18] sm:$0xff]  }
 0x403   :  { %v2292_v13 = vld [vmem:[#allocation21 + $0x10] sm:$0xff]  }
 0x404   :  { %v918_v19 = vmax.f32 %v914_v15, 0.0  ;;  %v2294_v15 = vld [vmem:[#allocation21 + $0x20] sm:$0xff]  }
 0x406   :  { %v935_v20 = vpack.c.bf16 %v918_v19, %v917_v17  ;;  %v2295_v17 = vld [vmem:[#allocation21 + $0x28] sm:$0xff]  }
 0x408   :  { %2095 = vmatmul.mubr.bf16.vlgmr.msra.gmra.mrb[8].mxu1 %v935_v20 }
 0x409   :  { %2152 = vmatprep.mubr.msk.bf16.mxu1 %vm2775_vm1, %v2773_v0  ;;  %2137 = vmatpush3.bf16.msra.mxu1 %v2290_v11 }
 0x40a   :  { %2138 = vmatprep.subr.bf16.mxu1 %v2773_v0 }
 0x40d   :  { %2139 = vmatpush3.bf16.msra.mxu1 %v2291_v12 }
 0x40e   :  { %2140 = vmatprep.subr.bf16.mxu1 %v2773_v0 }
 0x411   :  { %2141 = vmatpush3.bf16.msra.mxu1 %v2292_v13  ;;  %v1521_v13 = vld [vmem:[#allocation26] sm:$0x1] }
 0x412   :  { %2142 = vmatprep.subr.bf16.mxu1 %v2773_v0 }
 0x415   :  { %2143 = vmatpush3.bf16.msra.mxu1 %v2293_v14 }
 0x416   :  { %2144 = vmatprep.subr.bf16.mxu1 %v2773_v0 }
 0x419   :  { %2145 = vmatpush3.bf16.msra.mxu1 %v2294_v15 }
 0x41a   :  { %2146 = vmatprep.subr.bf16.mxu1 %v2773_v0 }
 0x41d   :  { %2147 = vmatpush3.bf16.msra.mxu1 %v2295_v17 }
 0x41e   :  { %2148 = vmatprep.subr.bf16.mxu1 %v2773_v0 }
 0x4db   :  { %v1025_v24 = vpop.f32.mrb[8].mxu1 }
 0x4dc   :  { %v1026_v25 = vadd.f32 %v1895_v21, %v1025_v24  ;;  %v2096_v26 = vpop.f32.mrb[9].mxu1 }
 0x4dd   :  { %v1028_v27 = vpop.f32.mrb[10].mxu1  ;;  %v2296_v26 = vld [vmem:[#allocation21 + $0x30] sm:$0xff]  }
 0x4de   :  { %v1029_v28 = vadd.f32 %v1895_v21, %v1028_v27  ;;  %v2097_v29 = vpop.f32.mrb[11].mxu1  ;;  %v1032_v30 = vmax.f32 %v1026_v25, 0.0  ;;  %2149 = vmatpush3.bf16.msra.mxu1 %v2296_v26  ;;  %v2297_v27 = vld [vmem:[#allocation21 + $0x38] sm:$0xff]  }
 0x4df   :  { %2150 = vmatprep.subr.bf16.mxu1 %v2773_v0 }
 0x4e0   :  { %v1033_v31 = vmax.f32 %v1029_v28, 0.0  ;;  %v1081_v16 = vmul.f32 %v1032_v30, %v1032_v30  ;;  %v1908_v28 = vld [vmem:[#allocation20] ss:$0 sm:$0xff] }
 0x4e2   :  { %v1037_v33 = vpack.c.bf16 %v1033_v31, %v1032_v30  ;;  %v1082_v34 = vmul.f32 %v1033_v31, %v1033_v31  ;;  %2151 = vmatpush3.bf16.msra.mxu1 %v2297_v27 }
 0x4e3   :  { %2162 = vmatprep.subr.bf16.mxu1 %v2773_v0 }
 0x4e4   :  { %2099 = vmatpush3.bf16.msra.mxu0 %v1037_v33  ;;  %v1083_v36 = vpack.c.bf16 %v1082_v34, %v1081_v16 }
 0x4e5   :  { %2104 = vmatprep.subr.bf16.mxu0 %v2773_v0 }
 0x4e7   :  { %2101 = vmatmul.mubr.msk.bf16.vlgmr.msra.gmra.mrb[16].mxu0 %vm539_vm2, %v3217_v35 }
 0x4e8   :  { %2105 = vmatpush3.bf16.msra.mxu0 %v1083_v36  ;;  %2106 = vmatprep.mubr.msk.bf16.mxu0 %vm2775_vm1, %v2773_v0 }
 0x4e9   :  { %2110 = vmatprep.subr.bf16.mxu0 %v2773_v0 }
 0x4ef   :  { %2107 = vmatmul.mubr.msk.bf16.vlgmr.msra.gmra.mrb[20].mxu0 %vm539_vm2, %v3217_v35 }
 0x4f0   :  { %2112 = vmatprep.mubr.msk.bf16.mxu0 %vm2775_vm1, %v2773_v0 }
 0x5ba   :  { %v1075_v38 = vpop.f32.mrb[16].mxu0 }
 0x5bb   :  { %v2102_v39 = vpop.f32.mrb[17].mxu0  ;;  %v1126_v43 = vmul.f32 %v3232_v40, %v1075_v38  ;;  %v1917_v38 = vld [vmem:[#allocation23] ss:$0 sm:$0xff] }
 0x5bc   :  { %v1078_v41 = vpop.f32.mrb[18].mxu0 }
 0x5bd   :  { %v2103_v42 = vpop.f32.mrb[19].mxu0  ;;  %v1128_v45 = vmul.f32 %v1126_v43, %v1126_v43 }
 0x5c2   :  { %v1118_v44 = vpop.f32.mrb[20].mxu0 }
 0x5c3   :  { %v1127_v46 = vmul.f32 %v3232_v40, %v1118_v44  ;;  %v2108_v47 = vpop.f32.mrb[21].mxu0 }
 0x5c4   :  { %v1121_v48 = vpop.f32.mrb[22].mxu0 }
 0x5c5   :  { %v1129_v49 = vsub.f32 %v1127_v46, %v1128_v45  ;;  %v2109_v50 = vpop.f32.mrb[23].mxu0 }
 0x5c7   :  { %v1130_v51 = vmax.f32 %v1129_v49, 0.0 }
 0x5c9   :  { %v1132_v52 = vadd.f32 1e-05, %v1130_v51 }
 0x5cb   :  { %2329 = vrsqrt.f32 %v1132_v52  ;;  %v2298_v52 = vld [vmem:[%s3374_s19] sm:$0xff]  }
 0x5d5   :  { %v2330_v54 = vpop.eup %2329 }
 0x5d6   :  { %v1134_v55 = vmul.f32 %v2330_v54, %v1131_v53  ;;  %v2299_v53 = vld [vmem:[%s3374_s19 + $0x8] sm:$0xff]   ;;  %v2301_v54 = vld [vmem:[%s3374_s19 + $0x18] sm:$0xff]  }
 0x5d8   :  { %v1136_v57 = vmul.f32 %v1134_v55, %v1126_v43  ;;  %v1142_v58 = vrot.slane %v1134_v55, %v3143_v18  ;;  %v2302_v55 = vld [vmem:[%s3374_s19 + $0x20] sm:$0xff]  }
 0x5da   :  { %v1137_v59 = vsub.f32 %v1135_v56, %v1136_v57  ;;  %v1144_v60 = vmul.f32 %v1142_v58, %v1032_v30  ;;  %v1145_v61 = vmul.f32 %v1142_v58, %v1033_v31  ;;  %v2303_v56 = vld [vmem:[%s3374_s19 + $0x28] sm:$0xff]   ;;  %v2304_v57 = vld [vmem:[%s3374_s19 + $0x30] sm:$0xff]   ;;  %v2305_v58 = vld [vmem:[%s3374_s19 + $0x38] sm:$0xff]  }
 0x5dc   :  { %v1150_v62 = vrot.slane %v1137_v59, %v3143_v18 }
 0x5de   :  { %v1152_v63 = vadd.f32 %v1150_v62, %v1144_v60  ;;  %v1153_v1 = vadd.f32 %v1150_v62, %v1145_v61 }
 0x5e0   :  { %v1154_v2 = vpack.c.bf16 %v1153_v1, %v1152_v63 }
 0x5e2   :  { %2111 = vmatpush3.bf16.msra.mxu0 %v1154_v2 }
 0x5e3   :  { %2116 = vmatprep.subr.bf16.mxu0 %v2773_v0 }
 0x5e5   :  { %2113 = vmatmul.mubr.msk.bf16.vlgmr.msra.gmra.mrb[24].mxu0 %vm539_vm2, %v3167_v10  ;;  %v2287_v10 = vld [vmem:[#allocation18 + $0x28] sm:$0xff]  }
 0x5e6   :  { %2117 = vmatpush3.bf16.msra.mxu0 %v2282_v3  ;;  %2132 = vmatprep.mubr.msk.bf16.mxu0 %vm2775_vm1, %v2773_v0 }
 0x5e7   :  { %2118 = vmatprep.subr.bf16.mxu0 %v2773_v0 }
 0x5ea   :  { %2119 = vmatpush3.bf16.msra.mxu0 %v2283_v4 }
 0x5eb   :  { %2120 = vmatprep.subr.bf16.mxu0 %v2773_v0 }
 0x5ee   :  { %2121 = vmatpush3.bf16.msra.mxu0 %v2284_v5 }
 0x5ef   :  { %2122 = vmatprep.subr.bf16.mxu0 %v2773_v0 }
 0x5f2   :  { %2123 = vmatpush3.bf16.msra.mxu0 %v2285_v6 }
 0x5f3   :  { %2124 = vmatprep.subr.bf16.mxu0 %v2773_v0 }
 0x5f6   :  { %2125 = vmatpush3.bf16.msra.mxu0 %v2286_v7 }
 0x5f7   :  { %2126 = vmatprep.subr.bf16.mxu0 %v2773_v0 }
 0x5fa   :  { %2127 = vmatpush3.bf16.msra.mxu0 %v2287_v10 }
 0x5fb   :  { %2128 = vmatprep.subr.bf16.mxu0 %v2773_v0 }
 0x5fe   :  { %2129 = vmatpush3.bf16.msra.mxu0 %v2288_v8 }
 0x5ff   :  { %2130 = vmatprep.subr.bf16.mxu0 %v2773_v0 }
 0x602   :  { %2131 = vmatpush3.bf16.msra.mxu0 %v2289_v9  ;;  %v1517_v9 = vld [vmem:[#allocation24] sm:$0x1] }
 0x603   :  { %2156 = vmatprep.subr.bf16.mxu0 %v2773_v0 }
 0x6b8   :  { %v1189_v19 = vpop.f32.mrb[24].mxu0 }
 0x6b9   :  { %v2114_v20 = vpop.f32.mrb[25].mxu0  ;;  %v1196_v22 = vadd.f32 %v1189_v19, %v1152_v63 }
 0x6ba   :  { %v1192_v21 = vpop.f32.mrb[26].mxu0 }
 0x6bb   :  { %v1197_v23 = vadd.f32 %v1192_v21, %v1153_v1  ;;  %v2115_v24 = vpop.f32.mrb[27].mxu0 }
 0x6bc   :  { %v1928_v24 = vld [vmem:[%s3375_s20] ss:$0 sm:$0xff]  ;;  %s2776_s20 = smov [#allocation30]  }
 0x6bd   :  { %v1214_v25 = vpack.c.bf16 %v1197_v23, %v1196_v22  ;;  %s1839_s5 = sshll.u32 %s2776_s20, 4  ;;  %s1840_s5 = int_to_ptr.vmem [resolvable:$true] %s1839_s5 }
 0x6be   :  { %s2685_s7 = scalar_lea.vmem %s1840_s5, 256  ;;  %p2690_p3 = scmp.lt.s32.totalorder %s1840_s5, %s1840_s5 }
 0x6bf   :  { %2133 = vmatmul.mubr.bf16.vlgmr.msra.gmra.mrb[28].mxu0 %v1214_v25  ;;  %p2686_p2 = scmp.ne.s32.totalorder %s1840_s5, %s2685_s7  ;;  %p2691_p4 = scmp.lt.s32.totalorder %s2685_s7, %s2685_s7 }
 0x6c0   :  { %2158 = vmatprep.mubr.msk.bf16.mxu0 %vm2775_vm1, %v2773_v0 }
 0x6c1   :  { %p2692_p5 = por %p2691_p4, %p2690_p3 }
 0x6c3   :  { %p2693_p6 = pnand %p2692_p5, %p2686_p2 }
 0x792   :  { %v1304_v29 = vpop.f32.mrb[28].mxu0 }
 0x793   :  { %v1305_v30 = vadd.f32 %v1908_v28, %v1304_v29  ;;  %v2134_v31 = vpop.f32.mrb[29].mxu0 }
 0x794   :  { %v1307_v32 = vpop.f32.mrb[30].mxu0 }
 0x795   :  { %v1308_v33 = vadd.f32 %v1908_v28, %v1307_v32  ;;  %v2135_v34 = vpop.f32.mrb[31].mxu0  ;;  %v1311_v16 = vmax.f32 %v1305_v30, 0.0  ;;  %v2306_v32 = vld [vmem:[#allocation9] sm:$0xff]  }
 0x796   :  { %v2309_v34 = vld [vmem:[#allocation27 + $0x10] sm:$0xff]  }
 0x797   :  { %v1312_v36 = vmax.f32 %v1308_v33, 0.0  ;;  %v2307_v33 = vld [vmem:[#allocation27] sm:$0xff]  }
 0x799   :  { %v1329_v37 = vpack.c.bf16 %v1312_v36, %v1311_v16  ;;  %v2310_v16 = vld [vmem:[#allocation27 + $0x18] sm:$0xff]   ;;  %v2311_v36 = vld [vmem:[#allocation27 + $0x20] sm:$0xff]  }
 0x79b   :  { %2153 = vmatmul.mubr.bf16.vlgmr.msra.gmra.mrb[12].mxu1 %v1329_v37  ;;  %v2312_v37 = vld [vmem:[#allocation27 + $0x28] sm:$0xff]  }
 0x79c   :  { %2164 = vmatprep.mubr.msk.bf16.mxu1 %vm2775_vm1, %v2773_v0 }
 0x86e   :  { %v1419_v39 = vpop.f32.mrb[12].mxu1 }
 0x86f   :  { %v1420_v41 = vadd.f32 %v1917_v38, %v1419_v39  ;;  %v2154_v42 = vpop.f32.mrb[13].mxu1  ;;  %v2314_v39 = vld [vmem:[#allocation27 + $0x38] sm:$0xff]  }
 0x870   :  { %v1422_v43 = vpop.f32.mrb[14].mxu1 }
 0x871   :  { %v1426_v44 = vmax.f32 %v1420_v41, 0.0  ;;  %v1423_v45 = vadd.f32 %v1917_v38, %v1422_v43  ;;  %v2155_v46 = vpop.f32.mrb[15].mxu1  ;;  %v2313_v38 = vld [vmem:[#allocation27 + $0x30] sm:$0xff]  }
 0x873   :  { %v1427_v47 = vmax.f32 %v1423_v45, 0.0  ;;  %v1469_v48 = vmul.f32 %v1426_v44, %v1426_v44 }
 0x875   :  { %v1428_v49 = vpack.c.bf16 %v1427_v47, %v1426_v44  ;;  %v1470_v50 = vmul.f32 %v1427_v47, %v1427_v47 }
 0x877   :  { %2157 = vmatpush3.bf16.msra.mxu0 %v1428_v49  ;;  %v1471_v51 = vpack.c.bf16 %v1470_v50, %v1469_v48 }
 0x878   :  { %2168 = vmatprep.subr.bf16.mxu0 %v2773_v0 }
 0x879   :  { %2163 = vmatpush3.bf16.msra.mxu1 %v1471_v51 }
 0x87a   :  { %2159 = vmatmul.mubr.msk.bf16.vlgmr.msra.gmra.mrb[32].mxu0 %vm539_vm2, %v3217_v35  ;;  %2188 = vmatprep.subr.bf16.mxu1 %v2773_v0 }
 0x87b   :  { %2184 = vmatprep.mubr.msk.bf16.mxu0 %vm2775_vm1, %v2773_v0  ;;  %2169 = vmatpush3.bf16.msra.mxu0 %v2298_v52 }
 0x87c   :  { %2165 = vmatmul.mubr.msk.bf16.vlgmr.msra.gmra.mrb[16].mxu1 %vm539_vm2, %v3217_v35  ;;  %2170 = vmatprep.subr.bf16.mxu0 %v2773_v0  ;;  %v2300_v35 = vld [vmem:[%s3374_s19 + $0x10] sm:$0xff]  }
 0x87d   :  { %2190 = vmatprep.mubr.msk.bf16.mxu1 %vm2775_vm1, %v2773_v0 }
 0x87f   :  { %2171 = vmatpush3.bf16.msra.mxu0 %v2299_v53 }
 0x880   :  { %2172 = vmatprep.subr.bf16.mxu0 %v2773_v0 }
 0x883   :  { %2173 = vmatpush3.bf16.msra.mxu0 %v2300_v35 }
 0x884   :  { %2174 = vmatprep.subr.bf16.mxu0 %v2773_v0 }
 0x887   :  { %2175 = vmatpush3.bf16.msra.mxu0 %v2301_v54 }
 0x888   :  { %2176 = vmatprep.subr.bf16.mxu0 %v2773_v0 }
 0x88b   :  { %2177 = vmatpush3.bf16.msra.mxu0 %v2302_v55 }
 0x88c   :  { %2178 = vmatprep.subr.bf16.mxu0 %v2773_v0 }
 0x88f   :  { %2179 = vmatpush3.bf16.msra.mxu0 %v2303_v56 }
 0x890   :  { %2180 = vmatprep.subr.bf16.mxu0 %v2773_v0 }
 0x893   :  { %2181 = vmatpush3.bf16.msra.mxu0 %v2304_v57 }
 0x894   :  { %2182 = vmatprep.subr.bf16.mxu0 %v2773_v0 }
 0x897   :  { %2183 = vmatpush3.bf16.msra.mxu0 %v2305_v58 }
 0x94d   :  { %v1463_v59 = vpop.f32.mrb[32].mxu0 }
 0x94e   :  { %v1512_v60 = vmul.f32 %v3232_v40, %v1463_v59  ;;  %v2160_v61 = vpop.f32.mrb[33].mxu0 }
 0x94f   :  { %v1466_v62 = vpop.f32.mrb[34].mxu0  ;;  %v1506_v63 = vpop.f32.mrb[16].mxu1 }
 0x950   :  { %v1514_v1 = vmul.f32 %v1512_v60, %v1512_v60  ;;  %v1513_v2 = vmul.f32 %v3232_v40, %v1506_v63  ;;  %v2161_v3 = vpop.f32.mrb[35].mxu0  ;;  %v2166_v4 = vpop.f32.mrb[17].mxu1 }
 0x951   :  { %v1509_v5 = vpop.f32.mrb[18].mxu1 }
 0x952   :  { %v1515_v6 = vsub.f32 %v1513_v2, %v1514_v1  ;;  %v2167_v7 = vpop.f32.mrb[19].mxu1 }
 0x954   :  { %v1516_v10 = vmax.f32 %v1515_v6, 0.0 }
 0x956   :  { %v1518_v8 = vadd.f32 1e-05, %v1516_v10 }
 0x958   :  { %2331 = vrsqrt.f32 %v1518_v8 }
 0x962   :  { %v2332_v11 = vpop.eup %2331 }
 0x963   :  { %v1520_v12 = vmul.f32 %v2332_v11, %v1517_v9 }
 0x965   :  { %v1522_v14 = vmul.f32 %v1520_v12, %v1512_v60  ;;  %v1528_v15 = vrot.slane %v1520_v12, %v3143_v18 }
 0x967   :  { %v1523_v17 = vsub.f32 %v1521_v13, %v1522_v14  ;;  %v1530_v19 = vmul.f32 %v1528_v15, %v1426_v44  ;;  %v1531_v20 = vmul.f32 %v1528_v15, %v1427_v47 }
 0x969   :  { %v1536_v40 = vrot.slane %v1523_v17, %v3143_v18  ;;  %v2308_v18 = vld [vmem:[#allocation27 + $0x8] sm:$0xff]  }
 0x96b   :  { %v1538_v21 = vadd.f32 %v1536_v40, %v1530_v19  ;;  %v1539_v22 = vadd.f32 %v1536_v40, %v1531_v20 }
 0x96d   :  { %v1556_v23 = vpack.c.bf16 %v1539_v22, %v1538_v21 }
 0x96f   :  { %2185 = vmatmul.mubr.bf16.vlgmr.msra.gmra.mrb[36].mxu0 %v1556_v23 }
 0xa42   :  { %v1646_v25 = vpop.f32.mrb[36].mxu0 }
 0xa43   :  { %v2186_v26 = vpop.f32.mrb[37].mxu0  ;;  %v1647_v28 = vadd.f32 %v1928_v24, %v1646_v25 }
 0xa44   :  { %v1649_v27 = vpop.f32.mrb[38].mxu0 }
 0xa45   :  { %v1650_v29 = vadd.f32 %v1928_v24, %v1649_v27  ;;  %v2187_v30 = vpop.f32.mrb[39].mxu0 }
 0xa47   :  { %v1655_v31 = vpack.c.bf16 %v1650_v29, %v1647_v28 }
 0xa49   :  { %2189 = vmatpush3.bf16.msra.mxu1 %v1655_v31 }
 0xa4a   :  { %2194 = vmatprep.subr.bf16.mxu1 %v2773_v0 }
 0xa4c   :  { %2191 = vmatmul.mubr.msk.bf16.vlgmr.msra.gmra.mrb[20].mxu1 %vm539_vm2, %v2306_v32 }
 0xa4d   :  { %2195 = vmatpush3.bf16.msra.mxu1 %v2307_v33  ;;  %2210 = vmatprep.mubr.msk.bf16.mxu1 %vm2775_vm1, %v2773_v0 }
 0xa4e   :  { %2196 = vmatprep.subr.bf16.mxu1 %v2773_v0 }
 0xa51   :  { %2197 = vmatpush3.bf16.msra.mxu1 %v2308_v18 }
 0xa52   :  { %2198 = vmatprep.subr.bf16.mxu1 %v2773_v0 }
 0xa55   :  { %2199 = vmatpush3.bf16.msra.mxu1 %v2309_v34 }
 0xa56   :  { %2200 = vmatprep.subr.bf16.mxu1 %v2773_v0 }
 0xa59   :  { %2201 = vmatpush3.bf16.msra.mxu1 %v2310_v16 }
 0xa5a   :  { %2202 = vmatprep.subr.bf16.mxu1 %v2773_v0 }
 0xa5d   :  { %2203 = vmatpush3.bf16.msra.mxu1 %v2311_v36 }
 0xa5e   :  { %2204 = vmatprep.subr.bf16.mxu1 %v2773_v0 }
 0xa61   :  { %2205 = vmatpush3.bf16.msra.mxu1 %v2312_v37 }
 0xa62   :  { %2206 = vmatprep.subr.bf16.mxu1 %v2773_v0 }
 0xa65   :  { %2207 = vmatpush3.bf16.msra.mxu1 %v2313_v38 }
 0xa66   :  { %2208 = vmatprep.subr.bf16.mxu1 %v2773_v0 }
 0xa69   :  { %2209 = vmatpush3.bf16.msra.mxu1 %v2314_v39 }
 0xb1f   :  { %v1698_v41 = vpop.f32.mrb[20].mxu1 }
 0xb20   :  { %1705 = vst [vmem:[#allocation30] sm:$0xff] %v1698_v41  ;;  %v2192_v42 = vpop.f32.mrb[21].mxu1 }
 0xb21   :  { %v1701_v43 = vpop.f32.mrb[22].mxu1 }
 0xb22   :  { %1706 = vst [vmem:[#allocation30 + $0x8] sm:$0xff] %v1701_v43  ;;  %v1723_v44 = vpack.c.bf16 %v1701_v43, %v1698_v41  ;;  %v2193_v45 = vpop.f32.mrb[23].mxu1 }
 0xb24   :  { %2211 = vmatmul.mubr.bf16.vlgmr.msra.gmra.mrb[24].mxu1 %v1723_v44 }
 0xb25   :  { %2696 = shalt.err (!%p2693_p6)
}
 0xb26   :  { %s3409_s8 = sld [smem:[#allocation54_spill]] }
 0xb2c   :  { %s2697_s0 = scalar_lea.hbm %s3409_s8, 256 }
 0xb2d   :  { %p2698_p7 = scmp.ne.s32.totalorder %s3409_s8, %s2697_s0  ;;  %p2701_p8 = scmp.lt.u32.totalorder %s2697_s0, %s3409_s8 }
 0xb2f   :  { %p2703_p9 = pnand %p2701_p8, %p2698_p7 }
 0xb31   :  { %2706 = shalt.err (!%p2703_p9)
}
 0xb32   :  { %1845 = dma.vmem_to_hbm [thread:$0]  %s1840_s5, 256, %s3409_s8, [#allocation31], %s2763_s17, %s2763_s17, %s2764_s9  }
 0xb33   :  { %s3410_s13 = sld [smem:[#allocation52_spill]]  ;;  %s2777_s24 = smov [#allocation29]  }
 0xb34   :  { %s1827_s3 = sshll.u32 %s2777_s24, 4  ;;  %s1828_s3 = int_to_ptr.vmem [resolvable:$true] %s1827_s3 }
 0xb35   :  { %s2707_s29 = scalar_lea.vmem %s1828_s3, 256  ;;  %p2712_p11 = scmp.lt.s32.totalorder %s1828_s3, %s1828_s3 }
 0xb36   :  { %p2708_p10 = scmp.ne.s32.totalorder %s1828_s3, %s2707_s29  ;;  %p2713_p12 = scmp.lt.s32.totalorder %s2707_s29, %s2707_s29 }
 0xb38   :  { %p2714_p13 = por %p2713_p12, %p2712_p11 }
 0xb39   :  { %v1939_v0 = vld [vmem:[%s3410_s13] ss:$0 sm:$0xff] }
 0xb3a   :  { %p2715_p0 = pnand %p2714_p13, %p2708_p10 }
 0xbf7   :  { %v1813_v46 = vpop.f32.mrb[24].mxu1 }
 0xbf8   :  { %v1814_v47 = vadd.f32 %v1939_v0, %v1813_v46  ;;  %v2212_v48 = vpop.f32.mrb[25].mxu1 }
 0xbf9   :  { %v1816_v49 = vpop.f32.mrb[26].mxu1 }
 0xbfa   :  { %1820 = vst [vmem:[#allocation29] sm:$0xff] %v1814_v47  ;;  %v1817_v50 = vadd.f32 %v1939_v0, %v1816_v49  ;;  %v2213_v51 = vpop.f32.mrb[27].mxu1 }
 0xbfc   :  { %1821 = vst [vmem:[#allocation29 + $0x8] sm:$0xff] %v1817_v50 }
 0xbfd   :  { %2718 = shalt.err (!%p2715_p0)
}
 0xbfe   :  { %s3411_s18 = sld [smem:[#allocation53_spill]] }
 0xc04   :  { %s2719_s11 = scalar_lea.hbm %s3411_s18, 256 }
 0xc05   :  { %p2720_p1 = scmp.ne.s32.totalorder %s3411_s18, %s2719_s11  ;;  %p2723_p2 = scmp.lt.u32.totalorder %s2719_s11, %s3411_s18 }
 0xc07   :  { %p2725_p3 = pnand %p2723_p2, %p2720_p1 }
 0xc09   :  { %2728 = shalt.err (!%p2725_p3)
}
 0xc0a   :  { %1833 = dma.vmem_to_hbm [thread:$0]  %s1828_s3, 256, %s3411_s18, [#allocation5], %s2763_s17, %s2763_s17, %s2764_s9  }
 0xc0b   :  { %2747 = dma.done.wait [#allocation5], 256  }
 0xc0c   :  { %2748 = vsyncadd [#allocation5], 4294967040 }
 0xc0d   :  { %2749 = dma.done.wait [#allocation31], 256  }
 0xc0e   :  { %2750 = vsyncadd [#allocation31], 4294967040 }
 0xc0f   :  { %1852 = vsyncpa [#allocation4], 1 }
 0xc10   :  { %1853 = vsyncpa [#allocation7], 1 }
 0xc11   :  { %1854 = vsyncpa [#allocation10], 1 }
 0xc12   :  { %1855 = vsyncpa [#allocation13], 1 }
 0xc13   :  { %1856 = vsyncpa [#allocation16], 1 }
 0xc14   :  { %1857 = vsyncpa [#allocation19], 1 }
 0xc15   :  { %1858 = vsyncpa [#allocation22], 1 }
 0xc16   :  { %1859 = vsyncpa [#allocation25], 1 }
 0xc17   :  { %1860 = vsyncpa [#allocation28], 1 }
 0xc18   :  { %1861 = vsyncpa [#allocation5], 1 }
 0xc19   :  { %1862 = vsyncpa [#allocation31], 1 }

</bundles_post_ra>
